<compile_context>
chip_gen: v7x
topology: tpu7x:2x2x1
jax: 0.10.0
libtpu: 0.0.40
codegen_flags: <defaults>
</compile_context>

<pallas_src>
import numpy as np

import jax
import jax.numpy as jnp
from jax.experimental import pallas as pl
from jax.experimental.pallas import tpu as pltpu


# -----------------------------------------------------------------------------
# Device-generation heuristics (wrapper-side only; never affect semantics)
# -----------------------------------------------------------------------------
def _device_kind():
    try:
        return jax.devices()[0].device_kind.lower()
    except Exception:
        return ""


def _num_tensorcores():
    # v7x has 2 TensorCores per chip; v5e/v6e have 1.  Keeping >= 2 grid steps
    # lets the ("parallel",) grid axis be split across both v7x cores.
    k = _device_kind()
    return 2 if ("v7" in k or "7x" in k) else 1


def _auto_stage2_dtype():
    # bf16 is the native MXU path on v6e/v7x; keep f32 elsewhere (v5e has no
    # bf16 VPU and the fused matmul is tiny anyway).
    k = _device_kind()
    if ("v6" in k) or ("v7" in k) or ("7x" in k):
        return jnp.bfloat16
    return jnp.float32


# -----------------------------------------------------------------------------
# Pallas kernel
# -----------------------------------------------------------------------------
def _flat_index(shape, idx):
    f = 0
    for i, s in zip(idx, shape):
        f = f * s + i
    return f


def make_social_cell_kernel(layout):
    """Builds the kernel body. `layout` maps small-weight names ->
    (offset, shape) inside the flat SMEM scalar bundle."""

    def kernel(x_ref, ws_ref, mask_ref, wbig_ref, bbig_ref, o_ref, a_ref):
        f32 = jnp.float32
        xp = x_ref[0]                         # (2, T+2, WF)
        T = xp.shape[1] - 2
        WF = xp.shape[2]
        WG = WF - 2                           # stage-1 (conv-centered) width
        WO = WF - 4                           # output / stage-2 width (k*128)

        def w(name, *idx):
            off, shape = layout[name]
            return ws_ref[off + _flat_index(shape, idx)]

        mask = mask_ref[...]                  # (1, WG) flank-column keep mask

        # ---- the only hoisted values: 6 full-width row-shifted slabs --------
        # xr[ci][kt] : (T, WF), reused by the global partials, the local branch
        # and both 1x1 highways (sublane shifts only, no lane offsets here).
        xr = []
        for ci in range(2):
            xi = xp[ci]                       # (T+2, WF)
            xr.append([xi[kt:kt + T, :] for kt in range(3)])

        # ---- stage 1, global branch: Conv2d(2->2,3x3) + ReLU + 1x1 highway --
        # Lane shifts are factored out of the MAC loop: for each output channel
        # accumulate three full-width partial sums S_kp (6 FMAs each) and
        # lane-shift each partial exactly once.  Partials are consumed as soon
        # as they are formed, keeping vreg live ranges bounded.
        for co in range(2):
            feat = None
            for kp in range(3):
                s = None
                for ci in range(2):
                    for kt in range(3):
                        term = w("wf_g", co, ci, kt, kp) * xr[ci][kt]
                        s = term if s is None else s + term
                s = s[:, kp:kp + WG]          # single lane shift per partial
                feat = s if feat is None else feat + s
            hw = (w("whi_g", co, 0) * xr[0][1] + w("whi_g", co, 1) * xr[1][1])
            g = (jnp.maximum(feat + w("bf_g", co), 0.0)
                 + hw[:, 1:1 + WG] + w("bhi_g", co)) * mask      # zero flanks
            # Stage the three pedestrian-shifted copies the fused stage-2
            # matmul needs (kp=0 copy is shift-free; kp=1,2 are lane shifts).
            for kp in range(3):
                r0 = 8 * (3 * co + kp)
                a_ref[r0:r0 + 8, :] = g[:, kp:kp + WO]

        # ---- stage 1, local branch: per-pedestrian Conv1d over time ---------
        # Computed at full width; the single lane-offset-2 slice happens at the
        # a_ref store (identical math to slicing the 18 windows up front).
        for co in range(2):
            featl = None
            for ci in range(2):
                for kt in range(3):
                    term = w("wf_l", co, ci, kt) * xr[ci][kt]
                    featl = term if featl is None else featl + term
            hwl = (w("whi_l", co, 0) * xr[0][1] + w("whi_l", co, 1) * xr[1][1])
            v1 = jnp.maximum(featl + w("bf_l", co), 0.0) + hwl + w("bhi_l", co)
            r0 = 8 * (6 + co)
            a_ref[r0:r0 + 8, :] = v1[:, 2:2 + WO]

        # ---- stage 2 + both highways + branch mix: one fused MXU matmul -----
        wb = wbig_ref[...]
        acts = a_ref[...]
        if acts.dtype != wb.dtype:            # native bf16 MXU path (v6e/v7x)
            acts = acts.astype(wb.dtype)
        out = jnp.dot(wb, acts, preferred_element_type=f32) + bbig_ref[...]
        o_ref[0] = out.astype(o_ref.dtype)    # single lane-dense (24, WO) store

    return kernel


# -----------------------------------------------------------------------------
# Wrapper (parameter plumbing + pallas_call)
# -----------------------------------------------------------------------------
_KC_TAPS = {0: ((1, 0), (2, 1)), 1: ((0, 0), (1, 1))}   # k=3, pad=1 over length-2 axis


def _build_scalar_bundle(p):
    entries = [
        ("wf_g", p["wf_g"]), ("bf_g", p["bf_g"]),
        ("whi_g", p["whi_g4"].reshape(2, 2)), ("bhi_g", p["bhi_g"]),
        ("wf_l", p["wf_l"]), ("bf_l", p["bf_l"]),
        ("whi_l", p["whi_l3"].reshape(2, 2)), ("bhi_l", p["bhi_l"]),
    ]
    layout, flats, off = {}, [], 0
    for name, arr in entries:
        layout[name] = (off, tuple(arr.shape))
        flats.append(arr.reshape(-1))
        off += int(arr.size)
    return jnp.concatenate(flats).astype(jnp.float32), layout


def _build_fused_stage2(p, stage2_dtype):
    """Fuse highway(8->12), tpcnn(8->12,k=3) of both branches and the
    global_w/local_w mix into one (24, 64) weight + (24, 1) bias.
    Activation slab order (8 rows each): G[0] kp=0..2, G[1] kp=0..2, V1[0], V1[1]."""
    f32 = jnp.float32
    gw = p["global_w"].astype(f32)[0]
    lw = p["local_w"].astype(f32)[0]
    whg = p["whg4"][:, :, 0, 0].astype(f32)     # (12, 8)
    wtg = p["wtg4"].astype(f32)                 # (12, 8, kc, kp)
    whl = p["whl3"][:, :, 0].astype(f32)        # (12, 8)
    wtl = p["wtl3"].astype(f32)                 # (12, 8, k)

    row_blocks = []
    for c in range(2):
        blocks = [jnp.zeros((12, 8), f32) for _ in range(8)]
        blocks[3 * c + 1] = blocks[3 * c + 1] + gw * whg          # global highway
        for kc, cp in _KC_TAPS[c]:                                # global tpcnn
            for kp in range(3):
                blocks[3 * cp + kp] = blocks[3 * cp + kp] + gw * wtg[:, :, kc, kp]
        blocks[6 + c] = blocks[6 + c] + lw * whl                  # local highway
        for k, cp in _KC_TAPS[c]:                                 # local tpcnn
            blocks[6 + cp] = blocks[6 + cp] + lw * wtl[:, :, k]
        row_blocks.append(jnp.concatenate(blocks, axis=1))        # (12, 64)
    wbig = jnp.concatenate(row_blocks, axis=0).astype(stage2_dtype)   # (24, 64)
    bvec = gw * (p["bhg"] + p["btg"]) + lw * (p["bhl"] + p["btl"])
    bbig = jnp.concatenate([bvec, bvec]).astype(f32).reshape(24, 1)
    return wbig, bbig


def social_cell_global_forward(v, params, batch_block=None, stage2_dtype=None,
                               target_lanes=512):
    N, C, T, P = v.shape
    assert C == 2 and T == 8, "module is defined for spatial_input=2, temporal_input=8"

    if stage2_dtype is None:
        stage2_dtype = _auto_stage2_dtype()

    # ---- how many batch items to fold onto the lane axis --------------------
    # Target ~512 output lanes per grid step (the per-step pipeline overhead is
    # ~600 cycles, so fewer/fatter steps win; VMEM is a non-issue at this size),
    # but keep >= num_tensorcores steps so v7x can shard the parallel axis.
    if batch_block is None:
        cores = _num_tensorcores()
        batch_block = min(max(1, target_lanes // (P + 4)), N)
        if cores > 1 and N >= cores:
            batch_block = min(batch_block, max(1, N // cores))
    B = int(batch_block)
    NB = -(-N // B)
    Npad = NB * B

    W_items = B * (P + 4)                    # lanes actually occupied by items
    WO = -(-W_items // 128) * 128            # output width: multiple of 128
    WF = WO + 4                              # folded input width in the kernel
    WG = WF - 2                              # stage-1 conv-centered width

    # ---- fold batch onto the pedestrian/lane axis ---------------------------
    x = jnp.pad(v.astype(jnp.float32),
                ((0, Npad - N), (0, 0), (1, 1), (2, 2)))     # (Npad,2,T+2,P+4)
    x = x.reshape(NB, B, 2, T + 2, P + 4).transpose(0, 2, 3, 1, 4)
    x = x.reshape(NB, 2, T + 2, W_items)
    x = jnp.pad(x, ((0, 0), (0, 0), (0, 0), (0, WF - W_items)))  # lane-align

    # ---- scalar (SMEM) weights of the tiny 2->2 stage-1 convs ---------------
    ws, layout = _build_scalar_bundle(params)

    # ---- flank-column keep-mask for the stage-1 global output ---------------
    fc = np.arange(WG) + 1                    # folded input column of each G col
    off = fc % (P + 4)
    keep = (off >= 2) & (off <= P + 1) & (fc < W_items)
    mask = jnp.asarray(keep.astype(np.float32)).reshape(1, WG)

    # ---- fused stage-2 weight/bias ------------------------------------------
    wbig, bbig = _build_fused_stage2(params, stage2_dtype)

    kernel = make_social_cell_kernel(layout)
    # ws/mask/wbig/bbig have constant index_maps; the Pallas TPU pipeline only
    # re-issues a block DMA when the block index changes, so they are fetched
    # once and stay resident for all grid steps.
    out = pl.pallas_call(
        kernel,
        out_shape=jax.ShapeDtypeStruct((NB, 24, WO), jnp.float32),
        grid=(NB,),
        in_specs=[
            pl.BlockSpec((1, 2, T + 2, WF), lambda n: (n, 0, 0, 0)),
            pl.BlockSpec(memory_space=pltpu.MemorySpace.SMEM),   # scalar weights
            pl.BlockSpec((1, WG), lambda n: (0, 0)),             # flank mask
            pl.BlockSpec((24, 64), lambda n: (0, 0)),            # fused stage-2 W
            pl.BlockSpec((24, 1), lambda n: (0, 0)),             # fused stage-2 b
        ],
        out_specs=pl.BlockSpec((1, 24, WO), lambda n: (n, 0, 0)),
        scratch_shapes=[pltpu.VMEM((64, WO), jnp.float32)],      # staged activations
        compiler_params=pltpu.CompilerParams(dimension_semantics=("parallel",)),
    )(x, ws, mask, wbig, bbig)

    # ---- unfold (NB, 24, WO) -> (N, 2, 12, P) --------------------------------
    out = out[:, :, :W_items].reshape(NB, 2, 12, B, P + 4)[..., :P]
    out = out.transpose(0, 3, 1, 2, 4).reshape(Npad, 2, 12, P)
    return out[:N]


# -----------------------------------------------------------------------------
# Pure-JAX reference (mirrors the PyTorch forward exactly)
# -----------------------------------------------------------------------------
def _conv2d(x, w, b, pad):
    y = jax.lax.conv_general_dilated(
        x, w, window_strides=(1, 1), padding=((pad, pad), (pad, pad)),
        dimension_numbers=("NCHW", "OIHW", "NCHW"))
    return y + b[None, :, None, None]


def _conv1d(x, w, b, pad):
    y = jax.lax.conv_general_dilated(
        x, w, window_strides=(1,), padding=((pad, pad),),
        dimension_numbers=("NCH", "OIH", "NCH"))
    return y + b[None, :, None]


def reference_forward(v, p):
    N, C, T, P = v.shape
    # --- SocialCellLocal ---
    vv = jnp.transpose(v, (0, 3, 1, 2)).reshape(N * P, C, T)
    vres = _conv1d(vv, p["whi_l3"], p["bhi_l"], 0)
    vv = jax.nn.relu(_conv1d(vv, p["wf_l"], p["bf_l"], 1)) + vres
    vv = jnp.transpose(vv, (0, 2, 1))
    vres = _conv1d(vv, p["whl3"], p["bhl"], 0)
    vv = _conv1d(vv, p["wtl3"], p["btl"], 1) + vres
    v_ped = jnp.transpose(jnp.transpose(vv, (0, 2, 1)).reshape(N, P, C, 12),
                          (0, 2, 3, 1))
    # --- global ---
    gres = _conv2d(v, p["whi_g4"], p["bhi_g"], 0)
    g = jax.nn.relu(_conv2d(v, p["wf_g"], p["bf_g"], 1)) + gres
    g = jnp.transpose(g, (0, 2, 1, 3))
    gres = _conv2d(g, p["whg4"], p["bhg"], 0)
    g = _conv2d(g, p["wtg4"], p["btg"], 1) + gres
    g = jnp.transpose(g, (0, 2, 1, 3))
    return p["global_w"] * g + p["local_w"] * v_ped


# -----------------------------------------------------------------------------
# Deterministic parameter init (shapes from the module's __init__)
# -----------------------------------------------------------------------------
def init_params(key):
    ks = jax.random.split(key, 18)
    rnd = lambda i, shape, s=0.2: s * jax.random.normal(ks[i], shape, jnp.float32)
    return {
        "wf_g": rnd(0, (2, 2, 3, 3)),   "bf_g": rnd(1, (2,), 0.1),
        "whi_g4": rnd(2, (2, 2, 1, 1)), "bhi_g": rnd(3, (2,), 0.1),
        "whg4": rnd(4, (12, 8, 1, 1)),  "bhg": rnd(5, (12,), 0.1),
        "wtg4": rnd(6, (12, 8, 3, 3)),  "btg": rnd(7, (12,), 0.1),
        "wf_l": rnd(8, (2, 2, 3)),      "bf_l": rnd(9, (2,), 0.1),
        "whi_l3": rnd(10, (2, 2, 1)),   "bhi_l": rnd(11, (2,), 0.1),
        "whl3": rnd(12, (12, 8, 1)),    "bhl": rnd(13, (12,), 0.1),
        "wtl3": rnd(14, (12, 8, 3)),    "btl": rnd(15, (12,), 0.1),
        # PyTorch initializes these mixing weights to zero (output would be 0);
        # use nonzero deterministic values so both branches are exercised.
        "global_w": rnd(16, (1,), 1.0),
        "local_w": rnd(17, (1,), 1.0),
        # TODO(synk): noise_w / noise_weight / weight_select are unused in the
        # reference forward pass, so they are not implemented here.
    }


if __name__ == "__main__":
    # Small, deliberately "awkward" shapes: N not divisible by the fold and
    # B*(P+4) not a multiple of 128, to exercise the lane-padding/mask path.
    N, C, T, P = 9, 2, 8, 27          # (batch, xy, obs_len, num_pedestrians)
    key = jax.random.PRNGKey(0)
    kparam, kx = jax.random.split(key)
    params = init_params(kparam)
    v = jax.random.normal(kx, (N, C, T, P), jnp.float32)

    out = jax.block_until_ready(social_cell_global_forward(v, params))
    ref = reference_forward(v, params)

    assert out.shape == (N, 2, 12, P), out.shape
    # Stage-2 runs through the native bf16 MXU path on v6e/v7x -> looser check.
    bf16_stage2 = _auto_stage2_dtype() == jnp.bfloat16
    atol = rtol = 5e-2 if bf16_stage2 else 1e-3
    if not jnp.allclose(out, ref, atol=atol, rtol=rtol):
        err = float(jnp.max(jnp.abs(out - ref)))
        raise AssertionError(f"kernel/reference mismatch, max abs err = {err}")
    print("KERNEL_OK")
</pallas_src>

<mosaic_0001>
module attributes {stable_mosaic.version = 11 : i64} {
  func.func @kernel(%arg0: i32, %arg1: memref<1x2x10x388xf32, #tpu.memory_space<vmem>>, %arg2: memref<64xf32, #tpu.memory_space<smem>>, %arg3: memref<1x386xf32, #tpu.memory_space<vmem>>, %arg4: memref<24x64xf32, #tpu.memory_space<vmem>>, %arg5: memref<24x1xf32, #tpu.memory_space<vmem>>, %arg6: memref<1x24x384xf32, #tpu.memory_space<vmem>>, %arg7: memref<64x384xf32, #tpu.memory_space<vmem>>) attributes {dimension_semantics = [#tpu.dimension_semantics<parallel>], iteration_bounds = array<i64: 1>, scalar_prefetch = 0 : i64, scratch_operands = 1 : i64, tpu.core_type = #tpu.core_type<tc>, window_params = [{transform_indices = @transform_0, window_bounds = array<i64: 1, 2, 10, 388>}, {transform_indices = @transform_1, window_bounds = array<i64: 64>}, {pipeline_mode = #tpu.pipeline_mode<synchronous>, transform_indices = @transform_2, window_bounds = array<i64: 1, 386>}, {pipeline_mode = #tpu.pipeline_mode<synchronous>, transform_indices = @transform_3, window_bounds = array<i64: 24, 64>}, {pipeline_mode = #tpu.pipeline_mode<synchronous>, transform_indices = @transform_4, window_bounds = array<i64: 24, 1>}, {transform_indices = @transform_5, window_bounds = array<i64: 1, 24, 384>}]} {
    %c0 = arith.constant 0 : index
    %c0_0 = arith.constant 0 : index
    %c0_1 = arith.constant 0 : index
    %c0_2 = arith.constant 0 : index
    %0 = vector.load %arg1[%c0, %c0_0, %c0_1, %c0_2] : memref<1x2x10x388xf32, #tpu.memory_space<vmem>>, vector<1x2x10x388xf32>
    %1 = vector.shape_cast %0 : vector<1x2x10x388xf32> to vector<2x10x388xf32>
    %c0_3 = arith.constant 0 : index
    %c0_4 = arith.constant 0 : index
    %2 = vector.load %arg3[%c0_3, %c0_4] : memref<1x386xf32, #tpu.memory_space<vmem>>, vector<1x386xf32>
    %3 = vector.extract_strided_slice %1 {offsets = [0, 0, 0], sizes = [1, 10, 388], strides = [1, 1, 1]} : vector<2x10x388xf32> to vector<1x10x388xf32>
    %4 = vector.shape_cast %3 : vector<1x10x388xf32> to vector<10x388xf32>
    %5 = vector.extract_strided_slice %4 {offsets = [0, 0], sizes = [8, 388], strides = [1, 1]} : vector<10x388xf32> to vector<8x388xf32>
    %6 = vector.extract_strided_slice %4 {offsets = [1, 0], sizes = [8, 388], strides = [1, 1]} : vector<10x388xf32> to vector<8x388xf32>
    %7 = vector.extract_strided_slice %4 {offsets = [2, 0], sizes = [8, 388], strides = [1, 1]} : vector<10x388xf32> to vector<8x388xf32>
    %8 = vector.extract_strided_slice %1 {offsets = [1, 0, 0], sizes = [1, 10, 388], strides = [1, 1, 1]} : vector<2x10x388xf32> to vector<1x10x388xf32>
    %9 = vector.shape_cast %8 : vector<1x10x388xf32> to vector<10x388xf32>
    %10 = vector.extract_strided_slice %9 {offsets = [0, 0], sizes = [8, 388], strides = [1, 1]} : vector<10x388xf32> to vector<8x388xf32>
    %11 = vector.extract_strided_slice %9 {offsets = [1, 0], sizes = [8, 388], strides = [1, 1]} : vector<10x388xf32> to vector<8x388xf32>
    %12 = vector.extract_strided_slice %9 {offsets = [2, 0], sizes = [8, 388], strides = [1, 1]} : vector<10x388xf32> to vector<8x388xf32>
    %c0_5 = arith.constant 0 : index
    %13 = memref.load %arg2[%c0_5] : memref<64xf32, #tpu.memory_space<smem>>
    %14 = vector.broadcast %13 : f32 to vector<8x388xf32>
    %15 = arith.mulf %14, %5 : vector<8x388xf32>
    %c3 = arith.constant 3 : index
    %16 = memref.load %arg2[%c3] : memref<64xf32, #tpu.memory_space<smem>>
    %17 = vector.broadcast %16 : f32 to vector<8x388xf32>
    %18 = arith.mulf %17, %6 : vector<8x388xf32>
    %19 = arith.addf %15, %18 : vector<8x388xf32>
    %c6 = arith.constant 6 : index
    %20 = memref.load %arg2[%c6] : memref<64xf32, #tpu.memory_space<smem>>
    %21 = vector.broadcast %20 : f32 to vector<8x388xf32>
    %22 = arith.mulf %21, %7 : vector<8x388xf32>
    %23 = arith.addf %19, %22 : vector<8x388xf32>
    %c9 = arith.constant 9 : index
    %24 = memref.load %arg2[%c9] : memref<64xf32, #tpu.memory_space<smem>>
    %25 = vector.broadcast %24 : f32 to vector<8x388xf32>
    %26 = arith.mulf %25, %10 : vector<8x388xf32>
    %27 = arith.addf %23, %26 : vector<8x388xf32>
    %c12 = arith.constant 12 : index
    %28 = memref.load %arg2[%c12] : memref<64xf32, #tpu.memory_space<smem>>
    %29 = vector.broadcast %28 : f32 to vector<8x388xf32>
    %30 = arith.mulf %29, %11 : vector<8x388xf32>
    %31 = arith.addf %27, %30 : vector<8x388xf32>
    %c15 = arith.constant 15 : index
    %32 = memref.load %arg2[%c15] : memref<64xf32, #tpu.memory_space<smem>>
    %33 = vector.broadcast %32 : f32 to vector<8x388xf32>
    %34 = arith.mulf %33, %12 : vector<8x388xf32>
    %35 = arith.addf %31, %34 : vector<8x388xf32>
    %36 = vector.extract_strided_slice %35 {offsets = [0, 0], sizes = [8, 386], strides = [1, 1]} : vector<8x388xf32> to vector<8x386xf32>
    %c1 = arith.constant 1 : index
    %37 = memref.load %arg2[%c1] : memref<64xf32, #tpu.memory_space<smem>>
    %38 = vector.broadcast %37 : f32 to vector<8x388xf32>
    %39 = arith.mulf %38, %5 : vector<8x388xf32>
    %c4 = arith.constant 4 : index
    %40 = memref.load %arg2[%c4] : memref<64xf32, #tpu.memory_space<smem>>
    %41 = vector.broadcast %40 : f32 to vector<8x388xf32>
    %42 = arith.mulf %41, %6 : vector<8x388xf32>
    %43 = arith.addf %39, %42 : vector<8x388xf32>
    %c7 = arith.constant 7 : index
    %44 = memref.load %arg2[%c7] : memref<64xf32, #tpu.memory_space<smem>>
    %45 = vector.broadcast %44 : f32 to vector<8x388xf32>
    %46 = arith.mulf %45, %7 : vector<8x388xf32>
    %47 = arith.addf %43, %46 : vector<8x388xf32>
    %c10 = arith.constant 10 : index
    %48 = memref.load %arg2[%c10] : memref<64xf32, #tpu.memory_space<smem>>
    %49 = vector.broadcast %48 : f32 to vector<8x388xf32>
    %50 = arith.mulf %49, %10 : vector<8x388xf32>
    %51 = arith.addf %47, %50 : vector<8x388xf32>
    %c13 = arith.constant 13 : index
    %52 = memref.load %arg2[%c13] : memref<64xf32, #tpu.memory_space<smem>>
    %53 = vector.broadcast %52 : f32 to vector<8x388xf32>
    %54 = arith.mulf %53, %11 : vector<8x388xf32>
    %55 = arith.addf %51, %54 : vector<8x388xf32>
    %c16 = arith.constant 16 : index
    %56 = memref.load %arg2[%c16] : memref<64xf32, #tpu.memory_space<smem>>
    %57 = vector.broadcast %56 : f32 to vector<8x388xf32>
    %58 = arith.mulf %57, %12 : vector<8x388xf32>
    %59 = arith.addf %55, %58 : vector<8x388xf32>
    %60 = vector.extract_strided_slice %59 {offsets = [0, 1], sizes = [8, 386], strides = [1, 1]} : vector<8x388xf32> to vector<8x386xf32>
    %61 = arith.addf %36, %60 : vector<8x386xf32>
    %c2 = arith.constant 2 : index
    %62 = memref.load %arg2[%c2] : memref<64xf32, #tpu.memory_space<smem>>
    %63 = vector.broadcast %62 : f32 to vector<8x388xf32>
    %64 = arith.mulf %63, %5 : vector<8x388xf32>
    %c5 = arith.constant 5 : index
    %65 = memref.load %arg2[%c5] : memref<64xf32, #tpu.memory_space<smem>>
    %66 = vector.broadcast %65 : f32 to vector<8x388xf32>
    %67 = arith.mulf %66, %6 : vector<8x388xf32>
    %68 = arith.addf %64, %67 : vector<8x388xf32>
    %c8 = arith.constant 8 : index
    %69 = memref.load %arg2[%c8] : memref<64xf32, #tpu.memory_space<smem>>
    %70 = vector.broadcast %69 : f32 to vector<8x388xf32>
    %71 = arith.mulf %70, %7 : vector<8x388xf32>
    %72 = arith.addf %68, %71 : vector<8x388xf32>
    %c11 = arith.constant 11 : index
    %73 = memref.load %arg2[%c11] : memref<64xf32, #tpu.memory_space<smem>>
    %74 = vector.broadcast %73 : f32 to vector<8x388xf32>
    %75 = arith.mulf %74, %10 : vector<8x388xf32>
    %76 = arith.addf %72, %75 : vector<8x388xf32>
    %c14 = arith.constant 14 : index
    %77 = memref.load %arg2[%c14] : memref<64xf32, #tpu.memory_space<smem>>
    %78 = vector.broadcast %77 : f32 to vector<8x388xf32>
    %79 = arith.mulf %78, %11 : vector<8x388xf32>
    %80 = arith.addf %76, %79 : vector<8x388xf32>
    %c17 = arith.constant 17 : index
    %81 = memref.load %arg2[%c17] : memref<64xf32, #tpu.memory_space<smem>>
    %82 = vector.broadcast %81 : f32 to vector<8x388xf32>
    %83 = arith.mulf %82, %12 : vector<8x388xf32>
    %84 = arith.addf %80, %83 : vector<8x388xf32>
    %85 = vector.extract_strided_slice %84 {offsets = [0, 2], sizes = [8, 386], strides = [1, 1]} : vector<8x388xf32> to vector<8x386xf32>
    %86 = arith.addf %61, %85 : vector<8x386xf32>
    %c38 = arith.constant 38 : index
    %87 = memref.load %arg2[%c38] : memref<64xf32, #tpu.memory_space<smem>>
    %88 = vector.broadcast %87 : f32 to vector<8x388xf32>
    %89 = arith.mulf %88, %6 : vector<8x388xf32>
    %c39 = arith.constant 39 : index
    %90 = memref.load %arg2[%c39] : memref<64xf32, #tpu.memory_space<smem>>
    %91 = vector.broadcast %90 : f32 to vector<8x388xf32>
    %92 = arith.mulf %91, %11 : vector<8x388xf32>
    %93 = arith.addf %89, %92 : vector<8x388xf32>
    %c36 = arith.constant 36 : index
    %94 = memref.load %arg2[%c36] : memref<64xf32, #tpu.memory_space<smem>>
    %95 = vector.broadcast %94 : f32 to vector<8x386xf32>
    %96 = arith.addf %86, %95 : vector<8x386xf32>
    %cst = arith.constant 0.000000e+00 : f32
    %97 = vector.broadcast %cst : f32 to vector<8x386xf32>
    %98 = arith.maximumf %96, %97 : vector<8x386xf32>
    %99 = vector.extract_strided_slice %93 {offsets = [0, 1], sizes = [8, 386], strides = [1, 1]} : vector<8x388xf32> to vector<8x386xf32>
    %100 = arith.addf %98, %99 : vector<8x386xf32>
    %c42 = arith.constant 42 : index
    %101 = memref.load %arg2[%c42] : memref<64xf32, #tpu.memory_space<smem>>
    %102 = vector.broadcast %101 : f32 to vector<8x386xf32>
    %103 = arith.addf %100, %102 : vector<8x386xf32>
    %104 = vector.broadcast %2 : vector<1x386xf32> to vector<8x386xf32>
    %105 = arith.mulf %103, %104 : vector<8x386xf32>
    %106 = vector.extract_strided_slice %105 {offsets = [0, 0], sizes = [8, 384], strides = [1, 1]} : vector<8x386xf32> to vector<8x384xf32>
    %c0_6 = arith.constant 0 : index
    %c0_7 = arith.constant 0 : index
    %107 = vector.load %arg7[%c0_6, %c0_7] : memref<64x384xf32, #tpu.memory_space<vmem>>, vector<8x384xf32>
    tpu.vector_store %arg7[%c0_6, %c0_7], %106 {strides = array<i32>} : memref<64x384xf32, #tpu.memory_space<vmem>>, vector<8x384xf32>,
    %108 = vector.extract_strided_slice %105 {offsets = [0, 1], sizes = [8, 384], strides = [1, 1]} : vector<8x386xf32> to vector<8x384xf32>
    %c8_8 = arith.constant 8 : index
    %c0_9 = arith.constant 0 : index
    %109 = vector.load %arg7[%c8_8, %c0_9] : memref<64x384xf32, #tpu.memory_space<vmem>>, vector<8x384xf32>
    tpu.vector_store %arg7[%c8_8, %c0_9], %108 {strides = array<i32>} : memref<64x384xf32, #tpu.memory_space<vmem>>, vector<8x384xf32>,
    %110 = vector.extract_strided_slice %105 {offsets = [0, 2], sizes = [8, 384], strides = [1, 1]} : vector<8x386xf32> to vector<8x384xf32>
    %c16_10 = arith.constant 16 : index
    %c0_11 = arith.constant 0 : index
    %111 = vector.load %arg7[%c16_10, %c0_11] : memref<64x384xf32, #tpu.memory_space<vmem>>, vector<8x384xf32>
    tpu.vector_store %arg7[%c16_10, %c0_11], %110 {strides = array<i32>} : memref<64x384xf32, #tpu.memory_space<vmem>>, vector<8x384xf32>,
    %c18 = arith.constant 18 : index
    %112 = memref.load %arg2[%c18] : memref<64xf32, #tpu.memory_space<smem>>
    %113 = vector.broadcast %112 : f32 to vector<8x388xf32>
    %114 = arith.mulf %113, %5 : vector<8x388xf32>
    %c21 = arith.constant 21 : index
    %115 = memref.load %arg2[%c21] : memref<64xf32, #tpu.memory_space<smem>>
    %116 = vector.broadcast %115 : f32 to vector<8x388xf32>
    %117 = arith.mulf %116, %6 : vector<8x388xf32>
    %118 = arith.addf %114, %117 : vector<8x388xf32>
    %c24 = arith.constant 24 : index
    %119 = memref.load %arg2[%c24] : memref<64xf32, #tpu.memory_space<smem>>
    %120 = vector.broadcast %119 : f32 to vector<8x388xf32>
    %121 = arith.mulf %120, %7 : vector<8x388xf32>
    %122 = arith.addf %118, %121 : vector<8x388xf32>
    %c27 = arith.constant 27 : index
    %123 = memref.load %arg2[%c27] : memref<64xf32, #tpu.memory_space<smem>>
    %124 = vector.broadcast %123 : f32 to vector<8x388xf32>
    %125 = arith.mulf %124, %10 : vector<8x388xf32>
    %126 = arith.addf %122, %125 : vector<8x388xf32>
    %c30 = arith.constant 30 : index
    %127 = memref.load %arg2[%c30] : memref<64xf32, #tpu.memory_space<smem>>
    %128 = vector.broadcast %127 : f32 to vector<8x388xf32>
    %129 = arith.mulf %128, %11 : vector<8x388xf32>
    %130 = arith.addf %126, %129 : vector<8x388xf32>
    %c33 = arith.constant 33 : index
    %131 = memref.load %arg2[%c33] : memref<64xf32, #tpu.memory_space<smem>>
    %132 = vector.broadcast %131 : f32 to vector<8x388xf32>
    %133 = arith.mulf %132, %12 : vector<8x388xf32>
    %134 = arith.addf %130, %133 : vector<8x388xf32>
    %135 = vector.extract_strided_slice %134 {offsets = [0, 0], sizes = [8, 386], strides = [1, 1]} : vector<8x388xf32> to vector<8x386xf32>
    %c19 = arith.constant 19 : index
    %136 = memref.load %arg2[%c19] : memref<64xf32, #tpu.memory_space<smem>>
    %137 = vector.broadcast %136 : f32 to vector<8x388xf32>
    %138 = arith.mulf %137, %5 : vector<8x388xf32>
    %c22 = arith.constant 22 : index
    %139 = memref.load %arg2[%c22] : memref<64xf32, #tpu.memory_space<smem>>
    %140 = vector.broadcast %139 : f32 to vector<8x388xf32>
    %141 = arith.mulf %140, %6 : vector<8x388xf32>
    %142 = arith.addf %138, %141 : vector<8x388xf32>
    %c25 = arith.constant 25 : index
    %143 = memref.load %arg2[%c25] : memref<64xf32, #tpu.memory_space<smem>>
    %144 = vector.broadcast %143 : f32 to vector<8x388xf32>
    %145 = arith.mulf %144, %7 : vector<8x388xf32>
    %146 = arith.addf %142, %145 : vector<8x388xf32>
    %c28 = arith.constant 28 : index
    %147 = memref.load %arg2[%c28] : memref<64xf32, #tpu.memory_space<smem>>
    %148 = vector.broadcast %147 : f32 to vector<8x388xf32>
    %149 = arith.mulf %148, %10 : vector<8x388xf32>
    %150 = arith.addf %146, %149 : vector<8x388xf32>
    %c31 = arith.constant 31 : index
    %151 = memref.load %arg2[%c31] : memref<64xf32, #tpu.memory_space<smem>>
    %152 = vector.broadcast %151 : f32 to vector<8x388xf32>
    %153 = arith.mulf %152, %11 : vector<8x388xf32>
    %154 = arith.addf %150, %153 : vector<8x388xf32>
    %c34 = arith.constant 34 : index
    %155 = memref.load %arg2[%c34] : memref<64xf32, #tpu.memory_space<smem>>
    %156 = vector.broadcast %155 : f32 to vector<8x388xf32>
    %157 = arith.mulf %156, %12 : vector<8x388xf32>
    %158 = arith.addf %154, %157 : vector<8x388xf32>
    %159 = vector.extract_strided_slice %158 {offsets = [0, 1], sizes = [8, 386], strides = [1, 1]} : vector<8x388xf32> to vector<8x386xf32>
    %160 = arith.addf %135, %159 : vector<8x386xf32>
    %c20 = arith.constant 20 : index
    %161 = memref.load %arg2[%c20] : memref<64xf32, #tpu.memory_space<smem>>
    %162 = vector.broadcast %161 : f32 to vector<8x388xf32>
    %163 = arith.mulf %162, %5 : vector<8x388xf32>
    %c23 = arith.constant 23 : index
    %164 = memref.load %arg2[%c23] : memref<64xf32, #tpu.memory_space<smem>>
    %165 = vector.broadcast %164 : f32 to vector<8x388xf32>
    %166 = arith.mulf %165, %6 : vector<8x388xf32>
    %167 = arith.addf %163, %166 : vector<8x388xf32>
    %c26 = arith.constant 26 : index
    %168 = memref.load %arg2[%c26] : memref<64xf32, #tpu.memory_space<smem>>
    %169 = vector.broadcast %168 : f32 to vector<8x388xf32>
    %170 = arith.mulf %169, %7 : vector<8x388xf32>
    %171 = arith.addf %167, %170 : vector<8x388xf32>
    %c29 = arith.constant 29 : index
    %172 = memref.load %arg2[%c29] : memref<64xf32, #tpu.memory_space<smem>>
    %173 = vector.broadcast %172 : f32 to vector<8x388xf32>
    %174 = arith.mulf %173, %10 : vector<8x388xf32>
    %175 = arith.addf %171, %174 : vector<8x388xf32>
    %c32 = arith.constant 32 : index
    %176 = memref.load %arg2[%c32] : memref<64xf32, #tpu.memory_space<smem>>
    %177 = vector.broadcast %176 : f32 to vector<8x388xf32>
    %178 = arith.mulf %177, %11 : vector<8x388xf32>
    %179 = arith.addf %175, %178 : vector<8x388xf32>
    %c35 = arith.constant 35 : index
    %180 = memref.load %arg2[%c35] : memref<64xf32, #tpu.memory_space<smem>>
    %181 = vector.broadcast %180 : f32 to vector<8x388xf32>
    %182 = arith.mulf %181, %12 : vector<8x388xf32>
    %183 = arith.addf %179, %182 : vector<8x388xf32>
    %184 = vector.extract_strided_slice %183 {offsets = [0, 2], sizes = [8, 386], strides = [1, 1]} : vector<8x388xf32> to vector<8x386xf32>
    %185 = arith.addf %160, %184 : vector<8x386xf32>
    %c40 = arith.constant 40 : index
    %186 = memref.load %arg2[%c40] : memref<64xf32, #tpu.memory_space<smem>>
    %187 = vector.broadcast %186 : f32 to vector<8x388xf32>
    %188 = arith.mulf %187, %6 : vector<8x388xf32>
    %c41 = arith.constant 41 : index
    %189 = memref.load %arg2[%c41] : memref<64xf32, #tpu.memory_space<smem>>
    %190 = vector.broadcast %189 : f32 to vector<8x388xf32>
    %191 = arith.mulf %190, %11 : vector<8x388xf32>
    %192 = arith.addf %188, %191 : vector<8x388xf32>
    %c37 = arith.constant 37 : index
    %193 = memref.load %arg2[%c37] : memref<64xf32, #tpu.memory_space<smem>>
    %194 = vector.broadcast %193 : f32 to vector<8x386xf32>
    %195 = arith.addf %185, %194 : vector<8x386xf32>
    %cst_12 = arith.constant 0.000000e+00 : f32
    %196 = vector.broadcast %cst_12 : f32 to vector<8x386xf32>
    %197 = arith.maximumf %195, %196 : vector<8x386xf32>
    %198 = vector.extract_strided_slice %192 {offsets = [0, 1], sizes = [8, 386], strides = [1, 1]} : vector<8x388xf32> to vector<8x386xf32>
    %199 = arith.addf %197, %198 : vector<8x386xf32>
    %c43 = arith.constant 43 : index
    %200 = memref.load %arg2[%c43] : memref<64xf32, #tpu.memory_space<smem>>
    %201 = vector.broadcast %200 : f32 to vector<8x386xf32>
    %202 = arith.addf %199, %201 : vector<8x386xf32>
    %203 = vector.broadcast %2 : vector<1x386xf32> to vector<8x386xf32>
    %204 = arith.mulf %202, %203 : vector<8x386xf32>
    %205 = vector.extract_strided_slice %204 {offsets = [0, 0], sizes = [8, 384], strides = [1, 1]} : vector<8x386xf32> to vector<8x384xf32>
    %c24_13 = arith.constant 24 : index
    %c0_14 = arith.constant 0 : index
    %206 = vector.load %arg7[%c24_13, %c0_14] : memref<64x384xf32, #tpu.memory_space<vmem>>, vector<8x384xf32>
    tpu.vector_store %arg7[%c24_13, %c0_14], %205 {strides = array<i32>} : memref<64x384xf32, #tpu.memory_space<vmem>>, vector<8x384xf32>,
    %207 = vector.extract_strided_slice %204 {offsets = [0, 1], sizes = [8, 384], strides = [1, 1]} : vector<8x386xf32> to vector<8x384xf32>
    %c32_15 = arith.constant 32 : index
    %c0_16 = arith.constant 0 : index
    %208 = vector.load %arg7[%c32_15, %c0_16] : memref<64x384xf32, #tpu.memory_space<vmem>>, vector<8x384xf32>
    tpu.vector_store %arg7[%c32_15, %c0_16], %207 {strides = array<i32>} : memref<64x384xf32, #tpu.memory_space<vmem>>, vector<8x384xf32>,
    %209 = vector.extract_strided_slice %204 {offsets = [0, 2], sizes = [8, 384], strides = [1, 1]} : vector<8x386xf32> to vector<8x384xf32>
    %c40_17 = arith.constant 40 : index
    %c0_18 = arith.constant 0 : index
    %210 = vector.load %arg7[%c40_17, %c0_18] : memref<64x384xf32, #tpu.memory_space<vmem>>, vector<8x384xf32>
    tpu.vector_store %arg7[%c40_17, %c0_18], %209 {strides = array<i32>} : memref<64x384xf32, #tpu.memory_space<vmem>>, vector<8x384xf32>,
    %c44 = arith.constant 44 : index
    %211 = memref.load %arg2[%c44] : memref<64xf32, #tpu.memory_space<smem>>
    %212 = vector.broadcast %211 : f32 to vector<8x388xf32>
    %213 = arith.mulf %212, %5 : vector<8x388xf32>
    %c45 = arith.constant 45 : index
    %214 = memref.load %arg2[%c45] : memref<64xf32, #tpu.memory_space<smem>>
    %215 = vector.broadcast %214 : f32 to vector<8x388xf32>
    %216 = arith.mulf %215, %6 : vector<8x388xf32>
    %217 = arith.addf %213, %216 : vector<8x388xf32>
    %c46 = arith.constant 46 : index
    %218 = memref.load %arg2[%c46] : memref<64xf32, #tpu.memory_space<smem>>
    %219 = vector.broadcast %218 : f32 to vector<8x388xf32>
    %220 = arith.mulf %219, %7 : vector<8x388xf32>
    %221 = arith.addf %217, %220 : vector<8x388xf32>
    %c47 = arith.constant 47 : index
    %222 = memref.load %arg2[%c47] : memref<64xf32, #tpu.memory_space<smem>>
    %223 = vector.broadcast %222 : f32 to vector<8x388xf32>
    %224 = arith.mulf %223, %10 : vector<8x388xf32>
    %225 = arith.addf %221, %224 : vector<8x388xf32>
    %c48 = arith.constant 48 : index
    %226 = memref.load %arg2[%c48] : memref<64xf32, #tpu.memory_space<smem>>
    %227 = vector.broadcast %226 : f32 to vector<8x388xf32>
    %228 = arith.mulf %227, %11 : vector<8x388xf32>
    %229 = arith.addf %225, %228 : vector<8x388xf32>
    %c49 = arith.constant 49 : index
    %230 = memref.load %arg2[%c49] : memref<64xf32, #tpu.memory_space<smem>>
    %231 = vector.broadcast %230 : f32 to vector<8x388xf32>
    %232 = arith.mulf %231, %12 : vector<8x388xf32>
    %233 = arith.addf %229, %232 : vector<8x388xf32>
    %c58 = arith.constant 58 : index
    %234 = memref.load %arg2[%c58] : memref<64xf32, #tpu.memory_space<smem>>
    %235 = vector.broadcast %234 : f32 to vector<8x388xf32>
    %236 = arith.mulf %235, %6 : vector<8x388xf32>
    %c59 = arith.constant 59 : index
    %237 = memref.load %arg2[%c59] : memref<64xf32, #tpu.memory_space<smem>>
    %238 = vector.broadcast %237 : f32 to vector<8x388xf32>
    %239 = arith.mulf %238, %11 : vector<8x388xf32>
    %240 = arith.addf %236, %239 : vector<8x388xf32>
    %c56 = arith.constant 56 : index
    %241 = memref.load %arg2[%c56] : memref<64xf32, #tpu.memory_space<smem>>
    %242 = vector.broadcast %241 : f32 to vector<8x388xf32>
    %243 = arith.addf %233, %242 : vector<8x388xf32>
    %cst_19 = arith.constant 0.000000e+00 : f32
    %244 = vector.broadcast %cst_19 : f32 to vector<8x388xf32>
    %245 = arith.maximumf %243, %244 : vector<8x388xf32>
    %246 = arith.addf %245, %240 : vector<8x388xf32>
    %c62 = arith.constant 62 : index
    %247 = memref.load %arg2[%c62] : memref<64xf32, #tpu.memory_space<smem>>
    %248 = vector.broadcast %247 : f32 to vector<8x388xf32>
    %249 = arith.addf %246, %248 : vector<8x388xf32>
    %250 = vector.extract_strided_slice %249 {offsets = [0, 2], sizes = [8, 384], strides = [1, 1]} : vector<8x388xf32> to vector<8x384xf32>
    %c48_20 = arith.constant 48 : index
    %c0_21 = arith.constant 0 : index
    %251 = vector.load %arg7[%c48_20, %c0_21] : memref<64x384xf32, #tpu.memory_space<vmem>>, vector<8x384xf32>
    tpu.vector_store %arg7[%c48_20, %c0_21], %250 {strides = array<i32>} : memref<64x384xf32, #tpu.memory_space<vmem>>, vector<8x384xf32>,
    %c50 = arith.constant 50 : index
    %252 = memref.load %arg2[%c50] : memref<64xf32, #tpu.memory_space<smem>>
    %253 = vector.broadcast %252 : f32 to vector<8x388xf32>
    %254 = arith.mulf %253, %5 : vector<8x388xf32>
    %c51 = arith.constant 51 : index
    %255 = memref.load %arg2[%c51] : memref<64xf32, #tpu.memory_space<smem>>
    %256 = vector.broadcast %255 : f32 to vector<8x388xf32>
    %257 = arith.mulf %256, %6 : vector<8x388xf32>
    %258 = arith.addf %254, %257 : vector<8x388xf32>
    %c52 = arith.constant 52 : index
    %259 = memref.load %arg2[%c52] : memref<64xf32, #tpu.memory_space<smem>>
    %260 = vector.broadcast %259 : f32 to vector<8x388xf32>
    %261 = arith.mulf %260, %7 : vector<8x388xf32>
    %262 = arith.addf %258, %261 : vector<8x388xf32>
    %c53 = arith.constant 53 : index
    %263 = memref.load %arg2[%c53] : memref<64xf32, #tpu.memory_space<smem>>
    %264 = vector.broadcast %263 : f32 to vector<8x388xf32>
    %265 = arith.mulf %264, %10 : vector<8x388xf32>
    %266 = arith.addf %262, %265 : vector<8x388xf32>
    %c54 = arith.constant 54 : index
    %267 = memref.load %arg2[%c54] : memref<64xf32, #tpu.memory_space<smem>>
    %268 = vector.broadcast %267 : f32 to vector<8x388xf32>
    %269 = arith.mulf %268, %11 : vector<8x388xf32>
    %270 = arith.addf %266, %269 : vector<8x388xf32>
    %c55 = arith.constant 55 : index
    %271 = memref.load %arg2[%c55] : memref<64xf32, #tpu.memory_space<smem>>
    %272 = vector.broadcast %271 : f32 to vector<8x388xf32>
    %273 = arith.mulf %272, %12 : vector<8x388xf32>
    %274 = arith.addf %270, %273 : vector<8x388xf32>
    %c60 = arith.constant 60 : index
    %275 = memref.load %arg2[%c60] : memref<64xf32, #tpu.memory_space<smem>>
    %276 = vector.broadcast %275 : f32 to vector<8x388xf32>
    %277 = arith.mulf %276, %6 : vector<8x388xf32>
    %c61 = arith.constant 61 : index
    %278 = memref.load %arg2[%c61] : memref<64xf32, #tpu.memory_space<smem>>
    %279 = vector.broadcast %278 : f32 to vector<8x388xf32>
    %280 = arith.mulf %279, %11 : vector<8x388xf32>
    %281 = arith.addf %277, %280 : vector<8x388xf32>
    %c57 = arith.constant 57 : index
    %282 = memref.load %arg2[%c57] : memref<64xf32, #tpu.memory_space<smem>>
    %283 = vector.broadcast %282 : f32 to vector<8x388xf32>
    %284 = arith.addf %274, %283 : vector<8x388xf32>
    %cst_22 = arith.constant 0.000000e+00 : f32
    %285 = vector.broadcast %cst_22 : f32 to vector<8x388xf32>
    %286 = arith.maximumf %284, %285 : vector<8x388xf32>
    %287 = arith.addf %286, %281 : vector<8x388xf32>
    %c63 = arith.constant 63 : index
    %288 = memref.load %arg2[%c63] : memref<64xf32, #tpu.memory_space<smem>>
    %289 = vector.broadcast %288 : f32 to vector<8x388xf32>
    %290 = arith.addf %287, %289 : vector<8x388xf32>
    %291 = vector.extract_strided_slice %290 {offsets = [0, 2], sizes = [8, 384], strides = [1, 1]} : vector<8x388xf32> to vector<8x384xf32>
    %c56_23 = arith.constant 56 : index
    %c0_24 = arith.constant 0 : index
    %292 = vector.load %arg7[%c56_23, %c0_24] : memref<64x384xf32, #tpu.memory_space<vmem>>, vector<8x384xf32>
    tpu.vector_store %arg7[%c56_23, %c0_24], %291 {strides = array<i32>} : memref<64x384xf32, #tpu.memory_space<vmem>>, vector<8x384xf32>,
    %c0_25 = arith.constant 0 : index
    %c0_26 = arith.constant 0 : index
    %293 = vector.load %arg4[%c0_25, %c0_26] : memref<24x64xf32, #tpu.memory_space<vmem>>, vector<24x64xf32>
    %c0_27 = arith.constant 0 : index
    %c0_28 = arith.constant 0 : index
    %294 = vector.load %arg7[%c0_27, %c0_28] : memref<64x384xf32, #tpu.memory_space<vmem>>, vector<64x384xf32>
    %cst_29 = arith.constant dense<0.000000e+00> : vector<24x384xf32>
    %295 = tpu.matmul %293, %294, %cst_29 {dimension_numbers = #tpu.dot_dimension_numbers<[1], [0], [0], [1], [0, 0, 1, 1], [], []>} : vector<24x64xf32>, vector<64x384xf32>, vector<24x384xf32> -> vector<24x384xf32>
    %c0_30 = arith.constant 0 : index
    %c0_31 = arith.constant 0 : index
    %296 = vector.load %arg5[%c0_30, %c0_31] : memref<24x1xf32, #tpu.memory_space<vmem>>, vector<24x1xf32>
    %297 = vector.broadcast %296 : vector<24x1xf32> to vector<24x384xf32>
    %298 = arith.addf %295, %297 : vector<24x384xf32>
    %c0_32 = arith.constant 0 : index
    %c0_33 = arith.constant 0 : index
    %c0_34 = arith.constant 0 : index
    %299 = vector.load %arg6[%c0_32, %c0_33, %c0_34] : memref<1x24x384xf32, #tpu.memory_space<vmem>>, vector<1x24x384xf32>
    %300 = vector.shape_cast %299 : vector<1x24x384xf32> to vector<24x384xf32>
    %301 = vector.shape_cast %298 : vector<24x384xf32> to vector<1x24x384xf32>
    tpu.vector_store %arg6[%c0_32, %c0_33, %c0_34], %301 {strides = array<i32>} : memref<1x24x384xf32, #tpu.memory_space<vmem>>, vector<1x24x384xf32>,
    return
  }
  func.func @transform_0(%arg0: i32) -> (i32, i32, i32, i32) {
    %c0_i32 = arith.constant 0 : i32
    %c0_i32_0 = arith.constant 0 : i32
    %c0_i32_1 = arith.constant 0 : i32
    %c0_i32_2 = arith.constant 0 : i32
    return %arg0, %c0_i32, %c0_i32_0, %c0_i32_1 : i32, i32, i32, i32
  }
  func.func @transform_1(%arg0: i32) -> i32 {
    %c0_i32 = arith.constant 0 : i32
    %c0_i32_0 = arith.constant 0 : i32
    return %c0_i32 : i32
  }
  func.func @transform_2(%arg0: i32) -> (i32, i32) {
    %c0_i32 = arith.constant 0 : i32
    %c0_i32_0 = arith.constant 0 : i32
    %c0_i32_1 = arith.constant 0 : i32
    return %c0_i32, %c0_i32_0 : i32, i32
  }
  func.func @transform_3(%arg0: i32) -> (i32, i32) {
    %c0_i32 = arith.constant 0 : i32
    %c0_i32_0 = arith.constant 0 : i32
    %c0_i32_1 = arith.constant 0 : i32
    return %c0_i32, %c0_i32_0 : i32, i32
  }
  func.func @transform_4(%arg0: i32) -> (i32, i32) {
    %c0_i32 = arith.constant 0 : i32
    %c0_i32_0 = arith.constant 0 : i32
    %c0_i32_1 = arith.constant 0 : i32
    return %c0_i32, %c0_i32_0 : i32, i32
  }
  func.func @transform_5(%arg0: i32) -> (i32, i32, i32) {
    %c0_i32 = arith.constant 0 : i32
    %c0_i32_0 = arith.constant 0 : i32
    %c0_i32_1 = arith.constant 0 : i32
    return %arg0, %c0_i32, %c0_i32_0 : i32, i32, i32
  }
}

</mosaic_0001>

<bundles_post_ra>
// kernel: tpu_custom_call.1
= control target key start
LH: loop header
LB: loop body
LE: loop exit
PB: predicated region body
PF: predicated region fallthrough
CT: control target
= control target key end

     0   :  { %10 = vsyncpa [#allocation5], 0  ;;  %s4222_s0 = inlined_call_operand.vmem [shape: f32[1,2,10,388], index: 0, kind: input, shape index: {}]   ;;  %s4223_s1 = inlined_call_operand.vmem [shape: f32[64], index: 1, kind: input, shape index: {}]   ;;  %s4224_s2 = inlined_call_operand.vmem [shape: f32[1,386], index: 2, kind: input, shape index: {}]   ;;  %s4225_s3 = inlined_call_operand.vmem [shape: f32[24,64], index: 3, kind: input, shape index: {}]   ;;  %s4226_s4 = inlined_call_operand.vmem [shape: f32[24,1], index: 4, kind: input, shape index: {}]   ;;  %s4227_s5 = inlined_call_operand.hbm [shape: f32[1,24,384], index: 5, kind: output, shape index: {}]  }
   0x1   :  { %11 = vsyncpa [#allocation4], 0  ;;  %s20_s20 = sshll.u32 %s4223_s1, 4  ;;  %s21_s20 = int_to_ptr.vmem [resolvable:$true] %s20_s20 }
   0x2   :  { %s2431_s21 = scalar_lea.vmem %s21_s20, 16  ;;  %p2436_p1 = scmp.lt.s32.totalorder %s21_s20, %s21_s20 }
   0x3   :  { %p2432_p0 = scmp.ne.s32.totalorder %s21_s20, %s2431_s21  ;;  %p2437_p2 = scmp.lt.s32.totalorder %s2431_s21, %s2431_s21 }
   0x5   :  { %p2438_p3 = por %p2437_p2, %p2436_p1 }
   0x7   :  { %p2439_p4 = pnand %p2438_p3, %p2432_p0 }
   0x9   :  { %2442 = shalt.err (!%p2439_p4)
}
   0xa   :  { %s2469_s22 = smov [#allocation3]  }
   0xb   :  { %23 = dma.vmem_to_smem %s21_s20, 16, %s2469_s22, [#allocation5]  }
   0xc   :  { %2465 = dma.done.wait [#allocation5], 16  }
   0xd   :  { %2466 = vsyncadd [#allocation5], 4294967280 }
   0xe   :  { %33 = sfence }
   0xf   :  { %s2215_s23 = sld [smem:[#allocation3 + $0x26]]  ;;  %s2216_s24 = sld [smem:[#allocation3 + $0x27]]  ;;  %v2515_v0 = vld [vmem:[%s4222_s0 + $0x10] sm:$0xff]  ;;  %v2537_v4 = vld [vmem:[%s4222_s0 + $0x8] sm:$0xff]  ;;  %vm75_vm0 = vcmask 1046528   ;;  %v2573_v14 = vld [vmem:[%s4222_s0 + $0x18] sm:$0xff] }
  0x10   :  { %v2520_v1 = vld [vmem:[%s4222_s0 + $0x30] sm:$0x3]  ;;  %s2522_s28 = sld [smem:[#allocation3 + $0x1]]  ;;  %s2539_s10 = sld [smem:[#allocation3 + $0x4]]  ;;  %v2544_v5 = vld [vmem:[%s4222_s0 + $0x28] sm:$0x3] }
  0x11   :  { %v2527_v2 = vld [vmem:[%s4222_s0 + $0x50] sm:$0xff]  ;;  %v2549_v6 = vld [vmem:[%s4222_s0 + $0x48] sm:$0xff]  ;;  %s2560_s17 = sld [smem:[#allocation3 + $0x7]]  ;;  %v2578_v15 = vld [vmem:[%s4222_s0 + $0x58] sm:$0xff]  ;;  %vm114_vm1 = vcmask 1045504   ;;  %s2600_s1 = sld [smem:[#allocation3 + $0xd]] }
  0x12   :  { %v2532_v3 = vld [vmem:[%s4222_s0 + $0x70] sm:$0x3]  ;;  %v2554_v7 = vld [vmem:[%s4222_s0 + $0x68] sm:$0x3]  ;;  %v2583_v16 = vld [vmem:[%s4222_s0 + $0x78] sm:$0x3] }
  0x13   :  { %v2598_v21 = vld [vmem:[%s4222_s0 + $0x38] sm:$0x3]  ;;  %s2602_s27 = sld [smem:[#allocation3 + $0x10]]  ;;  %s2717_s8 = sld [smem:[#allocation3 + $0x2]]  ;;  %vm401_vm2 = vcmask 1039360   ;;  %vm593_vm3 = vcmask 1031168  }
  0x14   :  { %s2726_s11 = sld [smem:[#allocation3 + $0x5]]  ;;  %s2737_s14 = sld [smem:[#allocation3 + $0x8]]  ;;  %vm2474_vm4 = vmmov 0   ;;  %vm1999_vm5 = vcmask 523264  }
  0x15   :  { %v2556_v8 = vstv %s2215_s23  ;;  %v2558_v9 = vstv %s2216_s24  ;;  %s2585_s24 = sld [smem:[#allocation3 + $0xa]]  ;;  %s2745_s15 = sld [smem:[#allocation3 + $0xb]] }
  0x16   :  { %v609_v10 = vmul.f32 %v2556_v8, %v2515_v0  ;;  %v613_v11 = vmul.f32 %v2556_v8, %v2520_v1  ;;  %v619_v12 = vmul.f32 %v2558_v9, %v2527_v2  ;;  %v623_v13 = vmul.f32 %v2558_v9, %v2532_v3  ;;  %s2750_s16 = sld [smem:[#allocation3 + $0xe]]  ;;  %s2471_s18 = smov 126  }
  0x17   :  { %v608_v17 = vmul.f32 %v2556_v8, %v2537_v4  ;;  %v612_v18 = vmul.f32 %v2556_v8, %v2544_v5  ;;  %v618_v19 = vmul.f32 %v2558_v9, %v2549_v6  ;;  %v622_v20 = vmul.f32 %v2558_v9, %v2554_v7  ;;  %s2853_s19 = sld [smem:[#allocation3 + $0x13]]  ;;  %s2859_s20 = sld [smem:[#allocation3 + $0x16]] }
  0x18   :  { %v627_v22 = vadd.f32 %v619_v12, %v609_v10  ;;  %v631_v23 = vadd.f32 %v623_v13, %v613_v11  ;;  %v610_v24 = vmul.f32 %v2556_v8, %v2573_v14  ;;  %v614_v25 = vmul.f32 %v2556_v8, %v2598_v21  ;;  %s2865_s21 = sld [smem:[#allocation3 + $0x19]]  ;;  %s2872_s22 = sld [smem:[#allocation3 + $0x1c]] }
  0x19   :  { %v626_v26 = vadd.f32 %v618_v19, %v608_v17  ;;  %v630_v27 = vadd.f32 %v622_v20, %v612_v18  ;;  %v620_v28 = vmul.f32 %v2558_v9, %v2578_v15  ;;  %v624_v29 = vmul.f32 %v2558_v9, %v2583_v16  ;;  %s2874_s23 = sld [smem:[#allocation3 + $0x1f]]  ;;  %s2966_s25 = sld [smem:[#allocation3 + $0x14]] }
  0x1a   :  { %v657_v30 = vrot.slane %v627_v22, 1  ;;  %v658_v31 = vrot.slane %v631_v23, 1  ;;  %v2613_v32 = vstv %s2522_s28  ;;  %v2616_v33 = vstv %s2539_s10  ;;  %s2470_s28 = smov 127   ;;  %s2975_s26 = sld [smem:[#allocation3 + $0x17]] }
  0x1b   :  { %v654_v34 = vrot.slane %v626_v26, 1  ;;  %v655_v35 = vrot.slane %v630_v27, 1  ;;  %v628_v36 = vadd.f32 %v620_v28, %v610_v24  ;;  %v632_v37 = vadd.f32 %v624_v29, %v614_v25  ;;  %s2991_s29 = sld [smem:[#allocation3 + $0x20]]  ;;  %s3000_s30 = sld [smem:[#allocation3 + $0x23]] }
  0x1c   :  { %v659_v38 = vsel %vm75_vm0, %v657_v30, %v658_v31  ;;  %v226_v39 = vmul.f32 %v2613_v32, %v2573_v14  ;;  %v232_v40 = vmul.f32 %v2616_v33, %v2573_v14  ;;  %v236_v41 = vmul.f32 %v2616_v33, %v2598_v21  ;;  %s3094_s6 = sld [smem:[#allocation3 + $0x28]]  ;;  %s3106_s7 = sld [smem:[#allocation3 + $0x29]] }
  0x1d   :  { %667 = vrot.lane.b32.xlu1 %v659_v38, %s2470_s28  ;;  %v656_v42 = vsel %vm75_vm0, %v654_v34, %v655_v35  ;;  %v660_v43 = vrot.slane %v628_v36, 1  ;;  %v661_v44 = vrot.slane %v632_v37, 1  ;;  %v2628_v45 = vstv %s2560_s17  ;;  %s2761_s17 = sld [smem:[#allocation3 + $0x11]]  ;;  %s3253_s10 = sld [smem:[#allocation3 + $0xc]] }
  0x1e   :  { %665 = vrot.lane.b32.xlu0 %v656_v42, %s2470_s28  ;;  %v254_v46 = vrot.slane %v232_v40, 1  ;;  %v255_v47 = vrot.slane %v236_v41, 1  ;;  %v270_v48 = vmul.f32 %v2628_v45, %v2573_v14  ;;  %v274_v49 = vmul.f32 %v2628_v45, %v2598_v21  ;;  %s3251_s9 = sld [smem:[#allocation3 + $0x9]]  ;;  %s3273_s13 = sld [smem:[#allocation3 + $0xf]] }
  0x1f   :  { %v662_v50 = vsel %vm75_vm0, %v660_v43, %v661_v44  ;;  %v2637_v51 = vstv %s2585_s24  ;;  %v2640_v52 = vstv %s2600_s1  ;;  %v2643_v53 = vstv %s2602_s27  ;;  %s2890_s24 = sld [smem:[#allocation3 + $0x22]]  ;;  %s2989_s27 = sld [smem:[#allocation3 + $0x1d]] }
  0x20   :  { %v256_v54 = vsel %vm75_vm0, %v254_v46, %v255_v47  ;;  %v292_v55 = vrot.slane %v270_v48, 2  ;;  %v293_v56 = vrot.slane %v274_v49, 2  ;;  %v308_v57 = vmul.f32 %v2637_v51, %v2578_v15  ;;  %s2983_s1 = sld [smem:[#allocation3 + $0x1a]]  ;;  %s3610_s12 = sld [smem:[#allocation3 + $0x31]] }
  0x21   :  { %v264_v58 = vadd.f32 %v256_v54, %v226_v39  ;;  %v318_v59 = vmul.f32 %v2640_v52, %v2578_v15  ;;  %v322_v60 = vmul.f32 %v2640_v52, %v2583_v16  ;;  %v356_v61 = vmul.f32 %v2643_v53, %v2578_v15 }
  0x22   :  { %669 = vrot.lane.b32.xlu0 %v662_v50, %s2470_s28  ;;  %v294_v62 = vsel %vm114_vm1, %v292_v55, %v293_v56  ;;  %v360_v63 = vmul.f32 %v2643_v53, %v2583_v16  ;;  %v224_v10 = vmul.f32 %v2613_v32, %v2537_v4  ;;  %v230_v11 = vmul.f32 %v2616_v33, %v2537_v4 }
  0x23   :  { %v302_v12 = vadd.f32 %v294_v62, %v264_v58  ;;  %v340_v13 = vrot.slane %v318_v59, 1  ;;  %v341_v17 = vrot.slane %v322_v60, 1  ;;  %v378_v18 = vrot.slane %v356_v61, 2 }
  0x24   :  { %v379_v19 = vrot.slane %v360_v63, 2  ;;  %v234_v20 = vmul.f32 %v2616_v33, %v2544_v5  ;;  %v248_v22 = vrot.slane %v230_v11, 1  ;;  %v268_v23 = vmul.f32 %v2628_v45, %v2537_v4 }
  0x25   :  { %v312_v24 = vadd.f32 %v308_v57, %v302_v12  ;;  %v342_v25 = vsel %vm75_vm0, %v340_v13, %v341_v17  ;;  %v272_v26 = vmul.f32 %v2628_v45, %v2544_v5  ;;  %v306_v27 = vmul.f32 %v2637_v51, %v2549_v6 }
  0x26   :  { %v380_v28 = vsel %vm114_vm1, %v378_v18, %v379_v19  ;;  %v249_v29 = vrot.slane %v234_v20, 1  ;;  %v286_v30 = vrot.slane %v268_v23, 2  ;;  %v316_v31 = vmul.f32 %v2640_v52, %v2549_v6  ;;  %v2709_v19 = vld [vmem:[%s4222_s0] sm:$0xff] }
  0x27   :  { %v350_v34 = vadd.f32 %v342_v25, %v312_v24  ;;  %v287_v35 = vrot.slane %v272_v26, 2  ;;  %v320_v36 = vmul.f32 %v2640_v52, %v2554_v7  ;;  %v354_v37 = vmul.f32 %v2643_v53, %v2549_v6  ;;  %v2714_v20 = vld [vmem:[%s4222_s0 + $0x20] sm:$0x3] }
  0x28   :  { %v250_v38 = vsel %vm75_vm0, %v248_v22, %v249_v29  ;;  %v334_v39 = vrot.slane %v316_v31, 1  ;;  %v358_v40 = vmul.f32 %v2643_v53, %v2554_v7  ;;  %v225_v41 = vmul.f32 %v2613_v32, %v2515_v0  ;;  %v2722_v29 = vld [vmem:[%s4222_s0 + $0x40] sm:$0xff] }
  0x29   :  { %v388_v42 = vadd.f32 %v380_v28, %v350_v34  ;;  %v262_v43 = vadd.f32 %v250_v38, %v224_v10  ;;  %v288_v44 = vsel %vm114_vm1, %v286_v30, %v287_v35  ;;  %v335_v46 = vrot.slane %v320_v36, 1  ;;  %v2731_v35 = vld [vmem:[%s4222_s0 + $0x60] sm:$0x3] }
  0x2a   :  { %v372_v47 = vrot.slane %v354_v37, 2  ;;  %v373_v48 = vrot.slane %v358_v40, 2  ;;  %v231_v49 = vmul.f32 %v2616_v33, %v2515_v0  ;;  %v235_v50 = vmul.f32 %v2616_v33, %v2520_v1 }
  0x2b   :  { %399 = vrot.lane.b32.xlu1 %v388_v42, %s2470_s28  ;;  %v300_v54 = vadd.f32 %v288_v44, %v262_v43  ;;  %v336_v55 = vsel %vm75_vm0, %v334_v39, %v335_v46  ;;  %v269_v56 = vmul.f32 %v2628_v45, %v2515_v0  ;;  %v273_v57 = vmul.f32 %v2628_v45, %v2520_v1 }
  0x2c   :  { %v374_v58 = vsel %vm114_vm1, %v372_v47, %v373_v48  ;;  %v251_v59 = vrot.slane %v231_v49, 1  ;;  %v252_v60 = vrot.slane %v235_v50, 1  ;;  %v307_v61 = vmul.f32 %v2637_v51, %v2527_v2 }
  0x2d   :  { %v310_v62 = vadd.f32 %v306_v27, %v300_v54  ;;  %v289_v63 = vrot.slane %v269_v56, 2  ;;  %v290_v10 = vrot.slane %v273_v57, 2  ;;  %v317_v11 = vmul.f32 %v2640_v52, %v2527_v2 }
  0x2e   :  { %v253_v12 = vsel %vm75_vm0, %v251_v59, %v252_v60  ;;  %v321_v13 = vmul.f32 %v2640_v52, %v2532_v3  ;;  %v355_v17 = vmul.f32 %v2643_v53, %v2527_v2  ;;  %v359_v18 = vmul.f32 %v2643_v53, %v2532_v3 }
  0x2f   :  { %v348_v22 = vadd.f32 %v336_v55, %v310_v62  ;;  %v263_v23 = vadd.f32 %v253_v12, %v225_v41  ;;  %v291_v24 = vsel %vm114_vm1, %v289_v63, %v290_v10  ;;  %v337_v25 = vrot.slane %v317_v11, 1 }
  0x30   :  { %v338_v26 = vrot.slane %v321_v13, 1  ;;  %v375_v27 = vrot.slane %v355_v17, 2  ;;  %v376_v28 = vrot.slane %v359_v18, 2  ;;  %v223_v30 = vmul.f32 %v2613_v32, %v2709_v19 }
  0x31   :  { %v386_v31 = vadd.f32 %v374_v58, %v348_v22  ;;  %v301_v34 = vadd.f32 %v291_v24, %v263_v23  ;;  %v229_v36 = vmul.f32 %v2616_v33, %v2709_v19  ;;  %v233_v37 = vmul.f32 %v2616_v33, %v2714_v20 }
  0x32   :  { %v339_v38 = vsel %vm75_vm0, %v337_v25, %v338_v26  ;;  %v377_v32 = vsel %vm114_vm1, %v375_v27, %v376_v28  ;;  %v267_v39 = vmul.f32 %v2628_v45, %v2709_v19  ;;  %v271_v40 = vmul.f32 %v2628_v45, %v2714_v20 }
  0x33   :  { %395 = vrot.lane.b32.xlu0 %v386_v31, %s2470_s28  ;;  %v311_v41 = vadd.f32 %v307_v61, %v301_v34  ;;  %v245_v42 = vrot.slane %v229_v36, 1  ;;  %v246_v43 = vrot.slane %v233_v37, 1  ;;  %v305_v33 = vmul.f32 %v2637_v51, %v2722_v29 }
  0x34   :  { %v283_v44 = vrot.slane %v267_v39, 2  ;;  %v284_v46 = vrot.slane %v271_v40, 2  ;;  %v315_v47 = vmul.f32 %v2640_v52, %v2722_v29  ;;  %v319_v45 = vmul.f32 %v2640_v52, %v2731_v35 }
  0x35   :  { %v349_v48 = vadd.f32 %v339_v38, %v311_v41  ;;  %v247_v49 = vsel %vm75_vm0, %v245_v42, %v246_v43  ;;  %v353_v50 = vmul.f32 %v2643_v53, %v2722_v29  ;;  %v357_v51 = vmul.f32 %v2643_v53, %v2731_v35 }
  0x36   :  { %v261_v54 = vadd.f32 %v247_v49, %v223_v30  ;;  %v285_v55 = vsel %vm114_vm1, %v283_v44, %v284_v46  ;;  %v331_v56 = vrot.slane %v315_v47, 1  ;;  %v332_v57 = vrot.slane %v319_v45, 1 }
  0x37   :  { %v387_v58 = vadd.f32 %v377_v32, %v349_v48  ;;  %v369_v52 = vrot.slane %v353_v50, 2  ;;  %v370_v59 = vrot.slane %v357_v51, 2  ;;  %v2765_v60 = vstv %s2717_s8  ;;  %s3565_s8 = sld [smem:[#allocation3 + $0x2d]] }
  0x38   :  { %v299_v61 = vadd.f32 %v285_v55, %v261_v54  ;;  %v333_v62 = vsel %vm75_vm0, %v331_v56, %v332_v57  ;;  %v416_v53 = vmul.f32 %v2765_v60, %v2537_v4  ;;  %v2771_v63 = vstv %s2726_s11  ;;  %s3606_s11 = sld [smem:[#allocation3 + $0x30]] }
  0x39   :  { %397 = vrot.lane.b32.xlu0 %v387_v58, %s2470_s28  ;;  %v371_v10 = vsel %vm114_vm1, %v369_v52, %v370_v59  ;;  %v422_v11 = vmul.f32 %v2771_v63, %v2537_v4  ;;  %v426_v12 = vmul.f32 %v2771_v63, %v2544_v5  ;;  %v2780_v13 = vstv %s2737_s14  ;;  %s3390_s14 = sld [smem:[#allocation3 + $0x24]] }
  0x3a   :  { %v309_v17 = vadd.f32 %v305_v33, %v299_v61  ;;  %v460_v18 = vmul.f32 %v2780_v13, %v2537_v4  ;;  %v464_v22 = vmul.f32 %v2780_v13, %v2544_v5  ;;  %v2787_v23 = vstv %s2745_s15  ;;  %s3392_s15 = sld [smem:[#allocation3 + $0x12]] }
  0x3b   :  { %v440_v24 = vrot.slane %v422_v11, 1  ;;  %v441_v25 = vrot.slane %v426_v12, 1  ;;  %v498_v26 = vmul.f32 %v2787_v23, %v2549_v6  ;;  %v2792_v27 = vstv %s2750_s16  ;;  %s3671_s16 = sld [smem:[#allocation3 + $0x3e]] }
  0x3c   :  { %v347_v28 = vadd.f32 %v333_v62, %v309_v17  ;;  %v478_v30 = vrot.slane %v460_v18, 2  ;;  %v479_v31 = vrot.slane %v464_v22, 2  ;;  %v508_v34 = vmul.f32 %v2792_v27, %v2549_v6 }
  0x3d   :  { %v442_v36 = vsel %vm75_vm0, %v440_v24, %v441_v25  ;;  %v512_v37 = vmul.f32 %v2792_v27, %v2554_v7  ;;  %v2800_v38 = vstv %s2761_s17  ;;  %v417_v32 = vmul.f32 %v2765_v60, %v2515_v0  ;;  %s3742_s17 = sld [smem:[#allocation3 + $0x25]] }
  0x3e   :  { %v385_v39 = vadd.f32 %v371_v10, %v347_v28  ;;  %v454_v40 = vadd.f32 %v442_v36, %v416_v53  ;;  %v480_v41 = vsel %vm114_vm1, %v478_v30, %v479_v31  ;;  %v526_v42 = vrot.slane %v508_v34, 1 }
  0x3f   :  { %v527_v43 = vrot.slane %v512_v37, 1  ;;  %v546_v33 = vmul.f32 %v2800_v38, %v2549_v6  ;;  %v550_v44 = vmul.f32 %v2800_v38, %v2554_v7  ;;  %v423_v46 = vmul.f32 %v2771_v63, %v2515_v0 }
  0x40   :  { %393 = vrot.lane.b32.xlu1 %v385_v39, %s2470_s28  ;;  %v492_v47 = vadd.f32 %v480_v41, %v454_v40  ;;  %v427_v45 = vmul.f32 %v2771_v63, %v2520_v1  ;;  %v461_v48 = vmul.f32 %v2780_v13, %v2515_v0  ;;  %v465_v49 = vmul.f32 %v2780_v13, %v2520_v1 }
  0x41   :  { %v528_v50 = vsel %vm75_vm0, %v526_v42, %v527_v43  ;;  %v564_v51 = vrot.slane %v546_v33, 2  ;;  %v565_v54 = vrot.slane %v550_v44, 2  ;;  %v443_v55 = vrot.slane %v423_v46, 1 }
  0x42   :  { %v502_v56 = vadd.f32 %v498_v26, %v492_v47  ;;  %v444_v57 = vrot.slane %v427_v45, 1  ;;  %v481_v58 = vrot.slane %v461_v48, 2  ;;  %v482_v52 = vrot.slane %v465_v49, 2 }
  0x43   :  { %v566_v59 = vsel %vm114_vm1, %v564_v51, %v565_v54  ;;  %v499_v61 = vmul.f32 %v2787_v23, %v2527_v2  ;;  %v509_v62 = vmul.f32 %v2792_v27, %v2527_v2  ;;  %v513_v53 = vmul.f32 %v2792_v27, %v2532_v3 }
  0x44   :  { %v540_v10 = vadd.f32 %v528_v50, %v502_v56  ;;  %v445_v11 = vsel %vm75_vm0, %v443_v55, %v444_v57  ;;  %v483_v12 = vsel %vm114_vm1, %v481_v58, %v482_v52  ;;  %v547_v17 = vmul.f32 %v2800_v38, %v2527_v2 }
  0x45   :  { %v455_v18 = vadd.f32 %v445_v11, %v417_v32  ;;  %v529_v22 = vrot.slane %v509_v62, 1  ;;  %v530_v24 = vrot.slane %v513_v53, 1  ;;  %v551_v25 = vmul.f32 %v2800_v38, %v2532_v3 }
  0x46   :  { %v578_v26 = vadd.f32 %v566_v59, %v540_v10  ;;  %v567_v28 = vrot.slane %v547_v17, 2  ;;  %v418_v30 = vmul.f32 %v2765_v60, %v2573_v14  ;;  %v424_v31 = vmul.f32 %v2771_v63, %v2573_v14 }
  0x47   :  { %v493_v34 = vadd.f32 %v483_v12, %v455_v18  ;;  %v531_v36 = vsel %vm75_vm0, %v529_v22, %v530_v24  ;;  %v568_v37 = vrot.slane %v551_v25, 2  ;;  %v428_v32 = vmul.f32 %v2771_v63, %v2598_v21 }
  0x48   :  { %587 = vrot.lane.b32.xlu0 %v578_v26, %s2471_s18  ;;  %v446_v39 = vrot.slane %v424_v31, 1  ;;  %v462_v40 = vmul.f32 %v2780_v13, %v2573_v14  ;;  %v466_v41 = vmul.f32 %v2780_v13, %v2598_v21  ;;  %v500_v42 = vmul.f32 %v2787_v23, %v2578_v15 }
  0x49   :  { %v503_v43 = vadd.f32 %v499_v61, %v493_v34  ;;  %v569_v33 = vsel %vm114_vm1, %v567_v28, %v568_v37  ;;  %v447_v44 = vrot.slane %v428_v32, 1  ;;  %v510_v46 = vmul.f32 %v2792_v27, %v2578_v15 }
  0x4a   :  { %v484_v47 = vrot.slane %v462_v40, 2  ;;  %v485_v45 = vrot.slane %v466_v41, 2  ;;  %v514_v48 = vmul.f32 %v2792_v27, %v2583_v16  ;;  %v548_v49 = vmul.f32 %v2800_v38, %v2578_v15 }
  0x4b   :  { %v541_v50 = vadd.f32 %v531_v36, %v503_v43  ;;  %v448_v51 = vsel %vm75_vm0, %v446_v39, %v447_v44  ;;  %v532_v54 = vrot.slane %v510_v46, 1  ;;  %v552_v55 = vmul.f32 %v2800_v38, %v2583_v16 }
  0x4c   :  { %v456_v56 = vadd.f32 %v448_v51, %v418_v30  ;;  %v486_v57 = vsel %vm114_vm1, %v484_v47, %v485_v45  ;;  %v533_v58 = vrot.slane %v514_v48, 1  ;;  %v570_v52 = vrot.slane %v548_v49, 2 }
  0x4d   :  { %v579_v59 = vadd.f32 %v569_v33, %v541_v50  ;;  %v571_v61 = vrot.slane %v552_v55, 2  ;;  %v415_v62 = vmul.f32 %v2765_v60, %v2709_v19  ;;  %v421_v53 = vmul.f32 %v2771_v63, %v2709_v19 }
  0x4e   :  { %v494_v10 = vadd.f32 %v486_v57, %v456_v56  ;;  %v534_v11 = vsel %vm75_vm0, %v532_v54, %v533_v58  ;;  %v425_v12 = vmul.f32 %v2771_v63, %v2714_v20  ;;  %v459_v17 = vmul.f32 %v2780_v13, %v2709_v19 }
  0x4f   :  { %589 = vrot.lane.b32.xlu1 %v579_v59, %s2471_s18  ;;  %v572_v60 = vsel %vm114_vm1, %v570_v52, %v571_v61  ;;  %v437_v18 = vrot.slane %v421_v53, 1  ;;  %v463_v22 = vmul.f32 %v2780_v13, %v2714_v20  ;;  %v497_v24 = vmul.f32 %v2787_v23, %v2722_v29 }
  0x50   :  { %v504_v63 = vadd.f32 %v500_v42, %v494_v10  ;;  %v438_v25 = vrot.slane %v425_v12, 1  ;;  %v475_v26 = vrot.slane %v459_v17, 2  ;;  %v507_v28 = vmul.f32 %v2792_v27, %v2722_v29 }
  0x51   :  { %v476_v30 = vrot.slane %v463_v22, 2  ;;  %v511_v31 = vmul.f32 %v2792_v27, %v2731_v35  ;;  %v545_v34 = vmul.f32 %v2800_v38, %v2722_v29  ;;  %v549_v13 = vmul.f32 %v2800_v38, %v2731_v35 }
  0x52   :  { %v542_v23 = vadd.f32 %v534_v11, %v504_v63  ;;  %v439_v36 = vsel %vm75_vm0, %v437_v18, %v438_v25  ;;  %v523_v37 = vrot.slane %v507_v28, 1  ;;  %v2894_v32 = vstv %s2853_s19  ;;  %s3404_s19 = sld [smem:[#allocation3 + $0x15]] }
  0x53   :  { %v453_v39 = vadd.f32 %v439_v36, %v415_v62  ;;  %v477_v27 = vsel %vm114_vm1, %v475_v26, %v476_v30  ;;  %v524_v40 = vrot.slane %v511_v31, 1  ;;  %v561_v41 = vrot.slane %v545_v34, 2 }
  0x54   :  { %v580_v42 = vadd.f32 %v572_v60, %v542_v23  ;;  %v562_v43 = vrot.slane %v549_v13, 2  ;;  %v926_v38 = vmul.f32 %v2894_v32, %v2515_v0  ;;  %v2900_v33 = vstv %s2859_s20  ;;  %s3406_s20 = sld [smem:[#allocation3 + $0x18]] }
  0x55   :  { %v491_v44 = vadd.f32 %v477_v27, %v453_v39  ;;  %v525_v46 = vsel %vm75_vm0, %v523_v37, %v524_v40  ;;  %v932_v47 = vmul.f32 %v2900_v33, %v2515_v0  ;;  %v936_v45 = vmul.f32 %v2900_v33, %v2520_v1 }
  0x56   :  { %591 = vrot.lane.b32.xlu0 %v580_v42, %s2471_s18  ;;  %v563_v48 = vsel %vm114_vm1, %v561_v41, %v562_v43  ;;  %v2910_v49 = vstv %s2865_s21  ;;  %v2913_v50 = vstv %s2872_s22  ;;  %v2916_v51 = vstv %s2874_s23  ;;  %s3216_s23 = sld [smem:[#allocation3]]  ;;  %s3822_s21 = sld [smem:[#allocation3 + $0x33]] }
  0x57   :  { %v501_v54 = vadd.f32 %v497_v24, %v491_v44  ;;  %v952_v55 = vrot.slane %v932_v47, 1  ;;  %v953_v56 = vrot.slane %v936_v45, 1  ;;  %v970_v57 = vmul.f32 %v2910_v49, %v2515_v0  ;;  %s3824_s22 = sld [smem:[#allocation3 + $0x34]] }
  0x58   :  { %v974_v58 = vmul.f32 %v2910_v49, %v2520_v1  ;;  %v1008_v52 = vmul.f32 %v2913_v50, %v2527_v2  ;;  %v1018_v59 = vmul.f32 %v2916_v51, %v2527_v2  ;;  %v1022_v61 = vmul.f32 %v2916_v51, %v2532_v3 }
  0x59   :  { %v539_v62 = vadd.f32 %v525_v46, %v501_v54  ;;  %v954_v53 = vsel %vm75_vm0, %v952_v55, %v953_v56  ;;  %v990_v10 = vrot.slane %v970_v57, 2  ;;  %v2930_v11 = vstv %s2890_s24  ;;  %s3218_s24 = sld [smem:[#allocation3 + $0x3]] }
  0x5a   :  { %v964_v12 = vadd.f32 %v954_v53, %v926_v38  ;;  %v991_v17 = vrot.slane %v974_v58, 2  ;;  %v1038_v60 = vrot.slane %v1018_v59, 1  ;;  %v1039_v18 = vrot.slane %v1022_v61, 1 }
  0x5b   :  { %v577_v22 = vadd.f32 %v563_v48, %v539_v62  ;;  %v1056_v24 = vmul.f32 %v2930_v11, %v2527_v2  ;;  %v1060_v63 = vmul.f32 %v2930_v11, %v2532_v3  ;;  %v925_v25 = vmul.f32 %v2894_v32, %v2537_v4 }
  0x5c   :  { %v992_v26 = vsel %vm114_vm1, %v990_v10, %v991_v17  ;;  %v1040_v28 = vsel %vm75_vm0, %v1038_v60, %v1039_v18  ;;  %v931_v30 = vmul.f32 %v2900_v33, %v2537_v4  ;;  %v935_v31 = vmul.f32 %v2900_v33, %v2544_v5 }
  0x5d   :  { %585 = vrot.lane.b32.xlu1 %v577_v22, %s2471_s18  ;;  %v1002_v34 = vadd.f32 %v992_v26, %v964_v12  ;;  %v1076_v13 = vrot.slane %v1056_v24, 2  ;;  %v1077_v23 = vrot.slane %v1060_v63, 2  ;;  %v969_v36 = vmul.f32 %v2910_v49, %v2537_v4 }
  0x5e   :  { %v949_v37 = vrot.slane %v931_v30, 1  ;;  %v950_v39 = vrot.slane %v935_v31, 1  ;;  %v973_v27 = vmul.f32 %v2910_v49, %v2544_v5  ;;  %v1007_v40 = vmul.f32 %v2913_v50, %v2549_v6 }
  0x5f   :  { %v1012_v41 = vadd.f32 %v1008_v52, %v1002_v34  ;;  %v1078_v42 = vsel %vm114_vm1, %v1076_v13, %v1077_v23  ;;  %v987_v43 = vrot.slane %v969_v36, 2  ;;  %v1017_v38 = vmul.f32 %v2916_v51, %v2549_v6 }
  0x60   :  { %v951_v44 = vsel %vm75_vm0, %v949_v37, %v950_v39  ;;  %v988_v46 = vrot.slane %v973_v27, 2  ;;  %v1021_v47 = vmul.f32 %v2916_v51, %v2554_v7  ;;  %v1055_v45 = vmul.f32 %v2930_v11, %v2549_v6 }
  0x61   :  { %v1050_v48 = vadd.f32 %v1040_v28, %v1012_v41  ;;  %v963_v54 = vadd.f32 %v951_v44, %v925_v25  ;;  %v1035_v55 = vrot.slane %v1017_v38, 1  ;;  %v1059_v56 = vmul.f32 %v2930_v11, %v2554_v7 }
  0x62   :  { %v989_v57 = vsel %vm114_vm1, %v987_v43, %v988_v46  ;;  %v1036_v58 = vrot.slane %v1021_v47, 1  ;;  %v1073_v52 = vrot.slane %v1055_v45, 2  ;;  %v607_v59 = vmul.f32 %v2556_v8, %v2709_v19 }
  0x63   :  { %v1088_v61 = vadd.f32 %v1078_v42, %v1050_v48  ;;  %v1001_v62 = vadd.f32 %v989_v57, %v963_v54  ;;  %v1074_v53 = vrot.slane %v1059_v56, 2  ;;  %v611_v10 = vmul.f32 %v2556_v8, %v2714_v20 }
  0x64   :  { %v1037_v12 = vsel %vm75_vm0, %v1035_v55, %v1036_v58  ;;  %v617_v17 = vmul.f32 %v2558_v9, %v2722_v29  ;;  %v621_v60 = vmul.f32 %v2558_v9, %v2731_v35  ;;  %v927_v18 = vmul.f32 %v2894_v32, %v2573_v14 }
  0x65   :  { %1098 = vrot.lane.b32.xlu0 %v1088_v61, %s2470_s28  ;;  %v1011_v22 = vadd.f32 %v1007_v40, %v1001_v62  ;;  %v1075_v8 = vsel %vm114_vm1, %v1073_v52, %v1074_v53  ;;  %v933_v24 = vmul.f32 %v2900_v33, %v2573_v14  ;;  %v937_v63 = vmul.f32 %v2900_v33, %v2598_v21 }
  0x66   :  { %v625_v25 = vadd.f32 %v617_v17, %v607_v59  ;;  %v629_v9 = vadd.f32 %v621_v60, %v611_v10  ;;  %v971_v26 = vmul.f32 %v2910_v49, %v2573_v14  ;;  %v975_v28 = vmul.f32 %v2910_v49, %v2598_v21 }
  0x67   :  { %v1049_v30 = vadd.f32 %v1037_v12, %v1011_v22  ;;  %v955_v31 = vrot.slane %v933_v24, 1  ;;  %v956_v34 = vrot.slane %v937_v63, 1  ;;  %v1009_v13 = vmul.f32 %v2913_v50, %v2578_v15 }
  0x68   :  { %v651_v23 = vrot.slane %v625_v25, 1  ;;  %v652_v36 = vrot.slane %v629_v9, 1  ;;  %v993_v37 = vrot.slane %v971_v26, 2  ;;  %v994_v39 = vrot.slane %v975_v28, 2 }
  0x69   :  { %v1087_v27 = vadd.f32 %v1075_v8, %v1049_v30  ;;  %v957_v40 = vsel %vm75_vm0, %v955_v31, %v956_v34  ;;  %v1019_v41 = vmul.f32 %v2916_v51, %v2578_v15  ;;  %v1023_v42 = vmul.f32 %v2916_v51, %v2583_v16 }
  0x6a   :  { %v653_v43 = vsel %vm75_vm0, %v651_v23, %v652_v36  ;;  %v965_v38 = vadd.f32 %v957_v40, %v927_v18  ;;  %v995_v44 = vsel %vm114_vm1, %v993_v37, %v994_v39  ;;  %v1057_v46 = vmul.f32 %v2930_v11, %v2578_v15 }
  0x6b   :  { %1096 = vrot.lane.b32.xlu1 %v1087_v27, %s2470_s28  ;;  %663 = vrot.lane.b32.xlu0 %v653_v43, %s2470_s28  ;;  %v1041_v47 = vrot.slane %v1019_v41, 1  ;;  %v1042_v45 = vrot.slane %v1023_v42, 1  ;;  %v1061_v48 = vmul.f32 %v2930_v11, %v2583_v16  ;;  %v3011_v54 = vstv %s2966_s25  ;;  %s3427_s25 = sld [smem:[#allocation3 + $0x1b]] }
  0x6c   :  { %v1003_v55 = vadd.f32 %v995_v44, %v965_v38  ;;  %v1079_v56 = vrot.slane %v1057_v46, 2  ;;  %v1116_v57 = vmul.f32 %v3011_v54, %v2537_v4  ;;  %v3016_v58 = vstv %s2975_s26  ;;  %s3429_s26 = sld [smem:[#allocation3 + $0x1e]] }
  0x6d   :  { %v1043_v52 = vsel %vm75_vm0, %v1041_v47, %v1042_v45  ;;  %v1080_v59 = vrot.slane %v1061_v48, 2  ;;  %v1122_v61 = vmul.f32 %v3016_v58, %v2537_v4  ;;  %v1126_v62 = vmul.f32 %v3016_v58, %v2544_v5 }
  0x6e   :  { %v1013_v53 = vadd.f32 %v1009_v13, %v1003_v55  ;;  %v3024_v10 = vstv %s2983_s1  ;;  %v3027_v12 = vstv %s2989_s27  ;;  %v3030_v17 = vstv %s2991_s29  ;;  %s3235_s29 = sld [smem:[#allocation3 + $0x6]]  ;;  %s3882_s1 = sld [smem:[#allocation3 + $0x3d]] }
  0x6f   :  { %v1081_v60 = vsel %vm114_vm1, %v1079_v56, %v1080_v59  ;;  %v1140_v18 = vrot.slane %v1122_v61, 1  ;;  %v1141_v22 = vrot.slane %v1126_v62, 1  ;;  %v1160_v8 = vmul.f32 %v3024_v10, %v2537_v4  ;;  %s3915_s27 = sld [smem:[#allocation3 + $0x39]] }
  0x70   :  { %v1051_v24 = vadd.f32 %v1043_v52, %v1013_v53  ;;  %v1164_v63 = vmul.f32 %v3024_v10, %v2544_v5  ;;  %v1198_v25 = vmul.f32 %v3027_v12, %v2549_v6  ;;  %v1208_v9 = vmul.f32 %v3030_v17, %v2549_v6 }
  0x71   :  { %v1142_v26 = vsel %vm75_vm0, %v1140_v18, %v1141_v22  ;;  %v1178_v28 = vrot.slane %v1160_v8, 2  ;;  %v1212_v30 = vmul.f32 %v3030_v17, %v2554_v7  ;;  %v3045_v31 = vstv %s3000_s30  ;;  %s3467_s30 = sld [smem:[#allocation3 + $0x2a]] }
  0x72   :  { %v1089_v34 = vadd.f32 %v1081_v60, %v1051_v24  ;;  %v1154_v4 = vadd.f32 %v1142_v26, %v1116_v57  ;;  %v1179_v13 = vrot.slane %v1164_v63, 2  ;;  %v1226_v23 = vrot.slane %v1208_v9, 1 }
  0x73   :  { %v1227_v36 = vrot.slane %v1212_v30, 1  ;;  %v1246_v5 = vmul.f32 %v3045_v31, %v2549_v6  ;;  %v1250_v37 = vmul.f32 %v3045_v31, %v2554_v7  ;;  %v924_v39 = vmul.f32 %v2894_v32, %v2709_v19 }
  0x74   :  { %1100 = vrot.lane.b32.xlu1 %v1089_v34, %s2470_s28  ;;  %v1180_v27 = vsel %vm114_vm1, %v1178_v28, %v1179_v13  ;;  %v930_v40 = vmul.f32 %v2900_v33, %v2709_v19  ;;  %v934_v41 = vmul.f32 %v2900_v33, %v2714_v20  ;;  %v968_v42 = vmul.f32 %v2910_v49, %v2709_v19 }
  0x75   :  { %v1192_v6 = vadd.f32 %v1180_v27, %v1154_v4  ;;  %v1228_v43 = vsel %vm75_vm0, %v1226_v23, %v1227_v36  ;;  %v1264_v7 = vrot.slane %v1246_v5, 2  ;;  %v1265_v38 = vrot.slane %v1250_v37, 2 }
  0x76   :  { %v946_v44 = vrot.slane %v930_v40, 1  ;;  %v947_v32 = vrot.slane %v934_v41, 1  ;;  %v972_v46 = vmul.f32 %v2910_v49, %v2714_v20  ;;  %v984_v47 = vrot.slane %v968_v42, 2 }
  0x77   :  { %v1202_v45 = vadd.f32 %v1198_v25, %v1192_v6  ;;  %v1266_v48 = vsel %vm114_vm1, %v1264_v7, %v1265_v38  ;;  %v1006_v33 = vmul.f32 %v2913_v50, %v2722_v29  ;;  %v1016_v55 = vmul.f32 %v2916_v51, %v2722_v29 }
  0x78   :  { %v948_v56 = vsel %vm75_vm0, %v946_v44, %v947_v32  ;;  %v985_v57 = vrot.slane %v972_v46, 2  ;;  %v1020_v52 = vmul.f32 %v2916_v51, %v2731_v35  ;;  %v1054_v59 = vmul.f32 %v2930_v11, %v2722_v29 }
  0x79   :  { %v1240_v49 = vadd.f32 %v1228_v43, %v1202_v45  ;;  %v962_v61 = vadd.f32 %v948_v56, %v924_v39  ;;  %v1032_v62 = vrot.slane %v1016_v55, 1  ;;  %v1058_v53 = vmul.f32 %v2930_v11, %v2731_v35 }
  0x7a   :  { %v986_v50 = vsel %vm114_vm1, %v984_v47, %v985_v57  ;;  %v1033_v60 = vrot.slane %v1020_v52, 1  ;;  %v1070_v18 = vrot.slane %v1054_v59, 2  ;;  %v1118_v22 = vmul.f32 %v3011_v54, %v2573_v14 }
  0x7b   :  { %v1278_v8 = vadd.f32 %v1266_v48, %v1240_v49  ;;  %v1000_v24 = vadd.f32 %v986_v50, %v962_v61  ;;  %v1071_v63 = vrot.slane %v1058_v53, 2  ;;  %v1124_v51 = vmul.f32 %v3016_v58, %v2573_v14 }
  0x7c   :  { %v1034_v25 = vsel %vm75_vm0, %v1032_v62, %v1033_v60  ;;  %v1128_v9 = vmul.f32 %v3016_v58, %v2598_v21  ;;  %v1162_v11 = vmul.f32 %v3024_v10, %v2573_v14  ;;  %v1166_v26 = vmul.f32 %v3024_v10, %v2598_v21 }
  0x7d   :  { %1287 = vrot.lane.b32.xlu0 %v1278_v8, %s2471_s18  ;;  %v1010_v28 = vadd.f32 %v1006_v33, %v1000_v24  ;;  %v1072_v30 = vsel %vm114_vm1, %v1070_v18, %v1071_v63  ;;  %v1146_v34 = vrot.slane %v1124_v51, 1  ;;  %v1200_v4 = vmul.f32 %v3027_v12, %v2578_v15  ;;  %v3137_v51 = vld [vmem:[%s4222_s0 + $0x8] sm:$0xff] }
  0x7e   :  { %v1147_v13 = vrot.slane %v1128_v9, 1  ;;  %v1184_v23 = vrot.slane %v1162_v11, 2  ;;  %v1185_v36 = vrot.slane %v1166_v26, 2  ;;  %v1210_v5 = vmul.f32 %v3030_v17, %v2578_v15  ;;  %v3144_v9 = vld [vmem:[%s4222_s0 + $0x28] sm:$0x3] }
  0x7f   :  { %v1048_v14 = vadd.f32 %v1034_v25, %v1010_v28  ;;  %v1214_v21 = vmul.f32 %v3030_v17, %v2583_v16  ;;  %v1248_v37 = vmul.f32 %v3045_v31, %v2578_v15  ;;  %v1252_v39 = vmul.f32 %v3045_v31, %v2583_v16 }
  0x80   :  { %v1148_v27 = vsel %vm75_vm0, %v1146_v34, %v1147_v13  ;;  %v1186_v40 = vsel %vm114_vm1, %v1184_v23, %v1185_v36  ;;  %v1232_v41 = vrot.slane %v1210_v5, 1  ;;  %v1117_v42 = vmul.f32 %v3011_v54, %v2515_v0  ;;  %v3156_v34 = vld [vmem:[%s4222_s0 + $0x48] sm:$0xff] }
  0x81   :  { %v1086_v6 = vadd.f32 %v1072_v30, %v1048_v14  ;;  %v1156_v43 = vadd.f32 %v1148_v27, %v1118_v22  ;;  %v1233_v7 = vrot.slane %v1214_v21, 1  ;;  %v1270_v38 = vrot.slane %v1248_v37, 2  ;;  %v3163_v13 = vld [vmem:[%s4222_s0 + $0x68] sm:$0x3] }
  0x82   :  { %v1271_v44 = vrot.slane %v1252_v39, 2  ;;  %v1123_v15 = vmul.f32 %v3016_v58, %v2515_v0  ;;  %v1127_v16 = vmul.f32 %v3016_v58, %v2520_v1  ;;  %v1161_v32 = vmul.f32 %v3024_v10, %v2515_v0 }
  0x83   :  { %1094 = vrot.lane.b32.xlu1 %v1086_v6, %s2470_s28  ;;  %v1194_v46 = vadd.f32 %v1186_v40, %v1156_v43  ;;  %v1234_v47 = vsel %vm75_vm0, %v1232_v41, %v1233_v7  ;;  %v1165_v45 = vmul.f32 %v3024_v10, %v2520_v1  ;;  %v1199_v48 = vmul.f32 %v3027_v12, %v2527_v2 }
  0x84   :  { %v1272_v33 = vsel %vm114_vm1, %v1270_v38, %v1271_v44  ;;  %v1143_v55 = vrot.slane %v1123_v15, 1  ;;  %v1144_v56 = vrot.slane %v1127_v16, 1  ;;  %v1181_v57 = vrot.slane %v1161_v32, 2 }
  0x85   :  { %v1204_v52 = vadd.f32 %v1200_v4, %v1194_v46  ;;  %v1182_v59 = vrot.slane %v1165_v45, 2  ;;  %v1209_v0 = vmul.f32 %v3030_v17, %v2527_v2  ;;  %v1213_v49 = vmul.f32 %v3030_v17, %v2532_v3 }
  0x86   :  { %v1145_v61 = vsel %vm75_vm0, %v1143_v55, %v1144_v56  ;;  %v1247_v1 = vmul.f32 %v3045_v31, %v2527_v2  ;;  %v1251_v62 = vmul.f32 %v3045_v31, %v2532_v3  ;;  %v3131_v53 = vstv %s3094_s6 }
  0x87   :  { %v1242_v50 = vadd.f32 %v1234_v47, %v1204_v52  ;;  %v1155_v60 = vadd.f32 %v1145_v61, %v1117_v42  ;;  %v1183_v18 = vsel %vm114_vm1, %v1181_v57, %v1182_v59  ;;  %v1229_v22 = vrot.slane %v1209_v0, 1  ;;  %v3205_v59 = vld [vmem:[%s4222_s0 + $0x38] sm:$0x3] }
  0x88   :  { %v1230_v8 = vrot.slane %v1213_v49, 1  ;;  %v1267_v24 = vrot.slane %v1247_v1, 2  ;;  %v1268_v63 = vrot.slane %v1251_v62, 2  ;;  %v1307_v2 = vmul.f32 %v3137_v51, %v3131_v53  ;;  %v3212_v0 = vld [vmem:[%s4222_s0 + $0x58] sm:$0xff] }
  0x89   :  { %v1280_v25 = vadd.f32 %v1272_v33, %v1242_v50  ;;  %v1193_v3 = vadd.f32 %v1183_v18, %v1155_v60  ;;  %v1311_v11 = vmul.f32 %v3144_v9, %v3131_v53  ;;  %v3149_v26 = vstv %s3106_s7  ;;  %v3224_v62 = vld [vmem:[%s4222_s0 + $0x78] sm:$0x3]  ;;  %v3231_v60 = vld [vmem:[%s4222_s0 + $0x10] sm:$0xff] }
  0x8a   :  { %v1231_v28 = vsel %vm75_vm0, %v1229_v22, %v1230_v8  ;;  %v1269_v30 = vsel %vm114_vm1, %v1267_v24, %v1268_v63  ;;  %v1317_v4 = vmul.f32 %v3156_v34, %v3149_v26  ;;  %v1321_v23 = vmul.f32 %v3163_v13, %v3149_v26  ;;  %v3240_v24 = vld [vmem:[%s4222_s0 + $0x30] sm:$0x3] }
  0x8b   :  { %1291 = vrot.lane.b32.xlu0 %v1280_v25, %s2471_s18  ;;  %v1203_v36 = vadd.f32 %v1199_v48, %v1193_v3  ;;  %v1115_v5 = vmul.f32 %v3011_v54, %v2709_v19  ;;  %v1121_v14 = vmul.f32 %v3016_v58, %v2709_v19  ;;  %v1125_v21 = vmul.f32 %v3016_v58, %v2714_v20 }
  0x8c   :  { %v1325_v37 = vadd.f32 %v1317_v4, %v1307_v2  ;;  %v1329_v39 = vadd.f32 %v1321_v23, %v1311_v11  ;;  %v1159_v27 = vmul.f32 %v3024_v10, %v2709_v19  ;;  %v1163_v40 = vmul.f32 %v3024_v10, %v2714_v20  ;;  %v3247_v2 = vld [vmem:[%s4222_s0 + $0x50] sm:$0xff] }
  0x8d   :  { %v1241_v41 = vadd.f32 %v1231_v28, %v1203_v36  ;;  %v1137_v42 = vrot.slane %v1121_v14, 1  ;;  %v1138_v6 = vrot.slane %v1125_v21, 1  ;;  %v1197_v54 = vmul.f32 %v3027_v12, %v2722_v29  ;;  %v3259_v28 = vld [vmem:[%s4222_s0 + $0x70] sm:$0x3] }
  0x8e   :  { %v1353_v43 = vrot.slane %v1325_v37, 1  ;;  %v1354_v7 = vrot.slane %v1329_v39, 1  ;;  %v1175_v38 = vrot.slane %v1159_v27, 2  ;;  %v1176_v44 = vrot.slane %v1163_v40, 2 }
  0x8f   :  { %v1279_v15 = vadd.f32 %v1269_v30, %v1241_v41  ;;  %v1139_v58 = vsel %vm75_vm0, %v1137_v42, %v1138_v6  ;;  %v1207_v16 = vmul.f32 %v3030_v17, %v2722_v29  ;;  %v1211_v32 = vmul.f32 %v3030_v17, %v2731_v35  ;;  %v3196_v17 = vld [vmem:[%s4222_s0 + $0x18] sm:$0xff]  ;;  %v668_v40 = vpop.permute.xlu1 %667 }
  0x90   :  { %v1355_v10 = vsel %vm75_vm0, %v1353_v43, %v1354_v7  ;;  %v1153_v46 = vadd.f32 %v1139_v58, %v1115_v5  ;;  %v1177_v47 = vsel %vm114_vm1, %v1175_v38, %v1176_v44  ;;  %v1245_v12 = vmul.f32 %v3045_v31, %v2722_v29  ;;  %v3200_v56 = vpop.permute.xlu0 %665 }
  0x91   :  { %1289 = vrot.lane.b32.xlu1 %v1279_v15, %s2471_s18  ;;  %1364 = vrot.lane.b32.xlu0 %v1355_v10, %s2470_s28  ;;  %v1223_v45 = vrot.slane %v1207_v16, 1  ;;  %v1224_v48 = vrot.slane %v1211_v32, 1  ;;  %v1249_v33 = vmul.f32 %v3045_v31, %v2731_v35  ;;  %v1309_v55 = vmul.f32 %v3196_v17, %v3131_v53 }
  0x92   :  { %v1191_v57 = vadd.f32 %v1177_v47, %v1153_v46  ;;  %v1261_v52 = vrot.slane %v1245_v12, 2  ;;  %v1313_v31 = vmul.f32 %v3205_v59, %v3131_v53  ;;  %v1319_v49 = vmul.f32 %v3212_v0, %v3149_v26 }
  0x93   :  { %v1225_v61 = vsel %vm75_vm0, %v1223_v45, %v1224_v48  ;;  %v1262_v1 = vrot.slane %v1249_v33, 2  ;;  %v1323_v50 = vmul.f32 %v3224_v62, %v3149_v26  ;;  %v1308_v18 = vmul.f32 %v3231_v60, %v3131_v53 }
  0x94   :  { %v1201_v22 = vadd.f32 %v1197_v54, %v1191_v57  ;;  %v1327_v8 = vadd.f32 %v1319_v49, %v1309_v55  ;;  %v1312_v63 = vmul.f32 %v3240_v24, %v3131_v53  ;;  %v1318_v25 = vmul.f32 %v3247_v2, %v3149_v26  ;;  %v3271_v41 = vpop.permute.xlu0 %669 }
  0x95   :  { %v1263_v3 = vsel %vm114_vm1, %v1261_v52, %v1262_v1  ;;  %v1331_v11 = vadd.f32 %v1323_v50, %v1313_v31  ;;  %v1322_v30 = vmul.f32 %v3259_v28, %v3149_v26  ;;  %v1306_v4 = vmul.f32 %v3131_v53, %v2709_v19 }
  0x96   :  { %v1239_v23 = vadd.f32 %v1225_v61, %v1201_v22  ;;  %v1359_v36 = vrot.slane %v1327_v8, 1  ;;  %v1326_v5 = vadd.f32 %v1318_v25, %v1308_v18  ;;  %v1310_v14 = vmul.f32 %v3131_v53, %v2714_v20 }
  0x97   :  { %v1360_v21 = vrot.slane %v1331_v11, 1  ;;  %v1330_v37 = vadd.f32 %v1322_v30, %v1312_v63  ;;  %v1316_v39 = vmul.f32 %v3149_v26, %v2722_v29  ;;  %v1320_v27 = vmul.f32 %v3149_v26, %v2731_v35 }
  0x98   :  { %v1277_v19 = vadd.f32 %v1263_v3, %v1239_v23  ;;  %v1356_v42 = vrot.slane %v1326_v5, 1  ;;  %v3280_v35 = vsel %vm401_vm2, %v3200_v56, %v668_v40  ;;  %v3284_v26 = vsel %vm401_vm2, %v668_v40, %v3271_v41 }
  0x99   :  { %v1361_v20 = vsel %vm75_vm0, %v1359_v36, %v1360_v21  ;;  %v1357_v53 = vrot.slane %v1330_v37, 1  ;;  %v1324_v29 = vadd.f32 %v1316_v39, %v1306_v4  ;;  %v1328_v6 = vadd.f32 %v1320_v27, %v1310_v14 }
  0x9a   :  { %1285 = vrot.lane.b32.xlu1 %v1277_v19, %s2471_s18  ;;  %1368 = vrot.lane.b32.xlu0 %v1361_v20, %s2470_s28  ;;  %v3287_v54 = vstv %s3216_s23  ;;  %v3290_v43 = vstv %s3218_s24  ;;  %s3851_s23 = sld [smem:[#allocation3 + $0x35]]  ;;  %s3865_s24 = sld [smem:[#allocation3 + $0x36]] }
  0x9b   :  { %v1358_v7 = vsel %vm75_vm0, %v1356_v42, %v1357_v53  ;;  %v1350_v38 = vrot.slane %v1324_v29, 1  ;;  %v1351_v44 = vrot.slane %v1328_v6, 1  ;;  %v62_v15 = vmul.f32 %v3196_v17, %v3290_v43 }
  0x9c   :  { %v66_v58 = vmul.f32 %v3205_v59, %v3290_v43  ;;  %v3298_v16 = vstv %s3235_s29  ;;  %v3301_v32 = vstv %s3251_s9  ;;  %v3304_v10 = vstv %s3253_s10  ;;  %s3451_s29 = sld [smem:[#allocation3 + $0x21]]  ;;  %s3585_s9 = sld [smem:[#allocation3 + $0x2e]] }
  0x9d   :  { %v56_v46 = vmul.f32 %v3196_v17, %v3287_v54  ;;  %v85_v47 = vrot.slane %v62_v15, 1  ;;  %v101_v12 = vmul.f32 %v3196_v17, %v3298_v16  ;;  %v105_v45 = vmul.f32 %v3205_v59, %v3298_v16  ;;  %s3587_s10 = sld [smem:[#allocation3 + $0x2f]] }
  0x9e   :  { %1366 = vrot.lane.b32.xlu1 %v1358_v7, %s2470_s28  ;;  %v1352_v48 = vsel %vm75_vm0, %v1350_v38, %v1351_v44  ;;  %v86_v33 = vrot.slane %v66_v58, 1  ;;  %v150_v55 = vmul.f32 %v3212_v0, %v3304_v10  ;;  %v154_v57 = vmul.f32 %v3224_v62, %v3304_v10 }
  0x9f   :  { %v124_v52 = vrot.slane %v101_v12, 2  ;;  %v125_v31 = vrot.slane %v105_v45, 2  ;;  %v140_v49 = vmul.f32 %v3212_v0, %v3301_v32  ;;  %v3321_v61 = vstv %s3273_s13  ;;  %s3656_s13 = sld [smem:[#allocation3 + $0x3a]] }
  0xa0   :  { %v87_v1 = vsel %vm75_vm0, %v85_v47, %v86_v33  ;;  %v172_v50 = vrot.slane %v150_v55, 1  ;;  %v173_v18 = vrot.slane %v154_v57, 1  ;;  %v188_v22 = vmul.f32 %v3212_v0, %v3321_v61  ;;  %v400_v57 = vpop.permute.xlu1 %399 }
  0xa1   :  { %v95_v8 = vadd.f32 %v87_v1, %v56_v46  ;;  %v126_v63 = vsel %vm114_vm1, %v124_v52, %v125_v31  ;;  %v192_v25 = vmul.f32 %v3224_v62, %v3321_v61  ;;  %v61_v3 = vmul.f32 %v3231_v60, %v3290_v43 }
  0xa2   :  { %1362 = vrot.lane.b32.xlu1 %v1352_v48, %s2470_s28  ;;  %v210_v11 = vrot.slane %v188_v22, 2  ;;  %v55_v30 = vmul.f32 %v3231_v60, %v3287_v54  ;;  %v3336_v4 = vmul.f32 %v3144_v9, %v3290_v43  ;;  %v65_v23 = vmul.f32 %v3240_v24, %v3290_v43 }
  0xa3   :  { %v134_v36 = vadd.f32 %v126_v63, %v95_v8  ;;  %v211_v5 = vrot.slane %v192_v25, 2  ;;  %v82_v14 = vrot.slane %v61_v3, 1  ;;  %v100_v21 = vmul.f32 %v3231_v60, %v3298_v16 }
  0xa4   :  { %v174_v37 = vsel %vm75_vm0, %v172_v50, %v173_v18  ;;  %v80_v39 = vrot.slane %v3336_v4, 1  ;;  %v83_v27 = vrot.slane %v65_v23, 1  ;;  %v104_v40 = vmul.f32 %v3240_v24, %v3298_v16 }
  0xa5   :  { %v144_v19 = vadd.f32 %v140_v49, %v134_v36  ;;  %v212_v42 = vsel %vm114_vm1, %v210_v11, %v211_v5  ;;  %v3347_v20 = vpop.permute.xlu0 %395  ;;  %v103_v53 = vmul.f32 %v3144_v9, %v3298_v16  ;;  %v121_v29 = vrot.slane %v100_v21, 2 }
  0xa6   :  { %v84_v6 = vsel %vm75_vm0, %v82_v14, %v83_v27  ;;  %v122_v7 = vrot.slane %v104_v40, 2  ;;  %v3354_v38 = vmul.f32 %v3156_v34, %v3301_v32  ;;  %v139_v44 = vmul.f32 %v3247_v2, %v3301_v32 }
  0xa7   :  { %v182_v15 = vadd.f32 %v174_v37, %v144_v19  ;;  %v94_v58 = vadd.f32 %v84_v6, %v55_v30  ;;  %v148_v46 = vmul.f32 %v3156_v34, %v3304_v10  ;;  %v149_v47 = vmul.f32 %v3247_v2, %v3304_v10  ;;  %v3398_v6 = vld [vmem:[%s4222_s0 + $0x20] sm:$0x3] }
  0xa8   :  { %v123_v12 = vsel %vm114_vm1, %v121_v29, %v122_v7  ;;  %v152_v45 = vmul.f32 %v3163_v13, %v3304_v10  ;;  %v153_v48 = vmul.f32 %v3259_v28, %v3304_v10  ;;  %v186_v33 = vmul.f32 %v3156_v34, %v3321_v61 }
  0xa9   :  { %v220_v55 = vadd.f32 %v212_v42, %v182_v15  ;;  %v133_v52 = vadd.f32 %v123_v12, %v94_v58  ;;  %v166_v31 = vrot.slane %v148_v46, 1  ;;  %v169_v49 = vrot.slane %v149_v47, 1  ;;  %v3412_v47 = vld [vmem:[%s4222_s0 + $0x40] sm:$0xff] }
  0xaa   :  { %v167_v1 = vrot.slane %v152_v45, 1  ;;  %v170_v50 = vrot.slane %v153_v48, 1  ;;  %v187_v18 = vmul.f32 %v3247_v2, %v3321_v61  ;;  %v190_v22 = vmul.f32 %v3163_v13, %v3321_v61 }
  0xab   :  { %v119_v8 = vrot.slane %v103_v53, 2  ;;  %v143_v63 = vadd.f32 %v139_v44, %v133_v52  ;;  %v191_v25 = vmul.f32 %v3259_v28, %v3321_v61  ;;  %v204_v3 = vrot.slane %v186_v33, 2  ;;  %v398_v11 = vpop.permute.xlu0 %397 }
  0xac   :  { %v3375_v30 = vadd.f32 %v400_v57, %v220_v55  ;;  %v171_v4 = vsel %vm75_vm0, %v169_v49, %v170_v50  ;;  %v205_v23 = vrot.slane %v190_v22, 2  ;;  %v207_v36 = vrot.slane %v187_v18, 2  ;;  %v3422_v55 = vld [vmem:[%s4222_s0 + $0x60] sm:$0x3] }
  0xad   :  { %v168_v5 = vsel %vm75_vm0, %v166_v31, %v167_v1  ;;  %v181_v14 = vadd.f32 %v171_v4, %v143_v63  ;;  %v208_v21 = vrot.slane %v191_v25, 2  ;;  %v60_v37 = vmul.f32 %v3137_v51, %v3290_v43 }
  0xae   :  { %v206_v27 = vsel %vm114_vm1, %v204_v3, %v205_v23  ;;  %v54_v40 = vmul.f32 %v3137_v51, %v3287_v54  ;;  %v99_v19 = vmul.f32 %v3137_v51, %v3298_v16  ;;  %v3388_v42 = vsel %vm401_vm2, %v3347_v20, %v398_v11 }
  0xaf   :  { %v209_v53 = vsel %vm114_vm1, %v207_v36, %v208_v21  ;;  %v79_v29 = vrot.slane %v60_v37, 1  ;;  %v63_v7 = vmul.f32 %v3398_v6, %v3290_v43  ;;  %v102_v44 = vmul.f32 %v3398_v6, %v3298_v16 }
  0xb0   :  { %v219_v15 = vadd.f32 %v209_v53, %v181_v14  ;;  %v118_v58 = vrot.slane %v99_v19, 2  ;;  %v404_v46 = vsel %vm401_vm2, %v398_v11, %v400_v57  ;;  %v147_v12 = vmul.f32 %v3412_v47, %v3304_v10 }
  0xb1   :  { %v81_v45 = vsel %vm75_vm0, %v79_v29, %v80_v39  ;;  %v77_v48 = vrot.slane %v63_v7, 1  ;;  %v137_v33 = vmul.f32 %v3412_v47, %v3301_v32  ;;  %v151_v57 = vmul.f32 %v3422_v55, %v3304_v10 }
  0xb2   :  { %v93_v52 = vadd.f32 %v81_v45, %v54_v40  ;;  %v120_v31 = vsel %vm114_vm1, %v118_v58, %v119_v8  ;;  %v116_v49 = vrot.slane %v102_v44, 2  ;;  %v163_v1 = vrot.slane %v147_v12, 1  ;;  %v394_v50 = vpop.permute.xlu1 %393  ;;  %v3440_v8 = vld [vmem:[%s4222_s0] sm:$0xff] }
  0xb3   :  { %v3431_v39 = vadd.f32 %v404_v46, %v219_v15  ;;  %v164_v32 = vrot.slane %v151_v57, 1  ;;  %v185_v18 = vmul.f32 %v3412_v47, %v3321_v61  ;;  %v189_v10 = vmul.f32 %v3422_v55, %v3321_v61 }
  0xb4   :  { %v132_v22 = vadd.f32 %v120_v31, %v93_v52  ;;  %v53_v63 = vmul.f32 %v3440_v8, %v3287_v54  ;;  %v59_v25 = vmul.f32 %v3440_v8, %v3290_v43  ;;  %v98_v3 = vmul.f32 %v3440_v8, %v3298_v16 }
  0xb5   :  { %v165_v61 = vsel %vm75_vm0, %v163_v1, %v164_v32  ;;  %v201_v11 = vrot.slane %v185_v18, 2  ;;  %v202_v4 = vrot.slane %v189_v10, 2  ;;  %v402_v23 = vsel %vm401_vm2, %v394_v50, %v3347_v20 }
  0xb6   :  { %v142_v36 = vadd.f32 %v3354_v38, %v132_v22  ;;  %v76_v14 = vrot.slane %v59_v25, 1  ;;  %v115_v54 = vrot.slane %v98_v3, 2  ;;  %v3455_v21 = vstv %s3390_s14  ;;  %s3658_s14 = sld [smem:[#allocation3 + $0x3b]] }
  0xb7   :  { %v203_v43 = vsel %vm114_vm1, %v201_v11, %v202_v4  ;;  %v3459_v16 = vstv %s3392_s15  ;;  %v3462_v37 = vstv %s3404_s19  ;;  %v3465_v40 = vstv %s3406_s20  ;;  %s3669_s15 = sld [smem:[#allocation3 + $0x38]]  ;;  %s3754_s19 = sld [smem:[#allocation3 + $0x2b]] }
  0xb8   :  { %v180_v20 = vadd.f32 %v168_v5, %v142_v36  ;;  %v78_v38 = vsel %vm75_vm0, %v76_v14, %v77_v48  ;;  %v117_v19 = vsel %vm114_vm1, %v115_v54, %v116_v49  ;;  %v757_v53 = vmul.f32 %v3137_v51, %v3459_v16  ;;  %s3815_s20 = sld [smem:[#allocation3 + $0x32]] }
  0xb9   :  { %v92_v29 = vadd.f32 %v78_v38, %v53_v63  ;;  %v763_v7 = vmul.f32 %v3137_v51, %v3462_v37  ;;  %v767_v44 = vmul.f32 %v3144_v9, %v3462_v37  ;;  %v801_v15 = vmul.f32 %v3137_v51, %v3465_v40 }
  0xba   :  { %v218_v58 = vadd.f32 %v206_v27, %v180_v20  ;;  %v805_v5 = vmul.f32 %v3144_v9, %v3465_v40  ;;  %v3482_v46 = vstv %s3427_s25  ;;  %v3485_v12 = vstv %s3429_s26  ;;  %v3501_v11 = vpop.permute.xlu0 %587  ;;  %s3867_s25 = sld [smem:[#allocation3 + $0x37]]  ;;  %s3880_s26 = sld [smem:[#allocation3 + $0x3c]] }
  0xbb   :  { %v131_v45 = vadd.f32 %v117_v19, %v92_v29  ;;  %v781_v48 = vrot.slane %v763_v7, 1  ;;  %v782_v57 = vrot.slane %v767_v44, 1  ;;  %v819_v52 = vrot.slane %v801_v15, 2 }
  0xbc   :  { %v410_v31 = vadd.f32 %v3388_v42, %v218_v58  ;;  %v820_v49 = vrot.slane %v805_v5, 2  ;;  %v839_v1 = vmul.f32 %v3156_v34, %v3482_v46  ;;  %v849_v27 = vmul.f32 %v3156_v34, %v3485_v12 }
  0xbd   :  { %v141_v50 = vadd.f32 %v137_v33, %v131_v45  ;;  %v783_v32 = vsel %vm75_vm0, %v781_v48, %v782_v57  ;;  %v853_v18 = vmul.f32 %v3163_v13, %v3485_v12  ;;  %v3496_v10 = vstv %s3451_s29  ;;  %s3927_s29 = sld [smem:[#allocation3 + $0x3f]] }
  0xbe   :  { %v795_v22 = vadd.f32 %v783_v32, %v757_v53  ;;  %v821_v63 = vsel %vm114_vm1, %v819_v52, %v820_v49  ;;  %v867_v42 = vrot.slane %v849_v27, 1  ;;  %v887_v25 = vmul.f32 %v3156_v34, %v3496_v10 }
  0xbf   :  { %v179_v3 = vadd.f32 %v165_v61, %v141_v50  ;;  %v868_v4 = vrot.slane %v853_v18, 1  ;;  %v891_v33 = vmul.f32 %v3163_v13, %v3496_v10  ;;  %v3506_v36 = vstv %s3467_s30 }
  0xc0   :  { %v833_v14 = vadd.f32 %v821_v63, %v795_v22  ;;  %v905_v54 = vrot.slane %v887_v25, 2  ;;  %v689_v20 = vlaneseq  ;;  %v758_v38 = vmul.f32 %v3231_v60, %v3459_v16 }
  0xc1   :  { %v217_v19 = vadd.f32 %v203_v43, %v179_v3  ;;  %v590_v53 = vpop.permute.xlu1 %589  ;;  %v869_v29 = vsel %vm75_vm0, %v867_v42, %v868_v4  ;;  %v906_v7 = vrot.slane %v891_v33, 2  ;;  %v759_v61 = vmul.f32 %v3196_v17, %v3459_v16 }
  0xc2   :  { %v595_v44 = vsel %vm593_vm3, %v3501_v11, %v590_v53  ;;  %v843_v15 = vadd.f32 %v839_v1, %v833_v14  ;;  %v3515_v58 = vshrl.u32 %v689_v20, 7  ;;  %v764_v5 = vmul.f32 %v3231_v60, %v3462_v37 }
  0xc3   :  { %v3519_v45 = vadd.f32 %v402_v23, %v217_v19  ;;  %v602_v48 = vadd.f32 %v595_v44, %v410_v31  ;;  %v907_v43 = vsel %vm114_vm1, %v905_v54, %v906_v7  ;;  %v765_v57 = vmul.f32 %v3196_v17, %v3462_v37  ;;  %v3533_v23 = vld [vmem:[%s4224_s2] sm:$0xf]  ;;  %s3563_s2 = sld [smem:[#allocation3 + $0x2c]] }
  0xc4   :  { %v881_v52 = vadd.f32 %v869_v29, %v843_v15  ;;  %v691_v49 = vsub.s32 0, %v3515_v58  ;;  %v768_v27 = vmul.f32 %v3240_v24, %v3462_v37  ;;  %v769_v1 = vmul.f32 %v3205_v59, %v3462_v37 }
  0xc5   :  { %v636_v50 = vadd.f32 %v3455_v21, %v602_v48  ;;  %v784_v31 = vrot.slane %v764_v5, 1  ;;  %v787_v32 = vrot.slane %v765_v57, 1  ;;  %v802_v18 = vmul.f32 %v3231_v60, %v3465_v40 }
  0xc6   :  { %v3537_v22 = vadd.f32 %v907_v43, %v881_v52  ;;  %v3540_v63 = vrot.slane %v3533_v23, %v691_v49  ;;  %v785_v42 = vrot.slane %v768_v27, 1  ;;  %v788_v25 = vrot.slane %v769_v1, 1 }
  0xc7   :  { %v640_v3 = vmax.f32 %v636_v50, 0.0  ;;  %v803_v4 = vmul.f32 %v3196_v17, %v3465_v40  ;;  %v806_v33 = vmul.f32 %v3240_v24, %v3465_v40  ;;  %v807_v14 = vmul.f32 %v3205_v59, %v3465_v40 }
  0xc8   :  { %v592_v54 = vpop.permute.xlu0 %591  ;;  %v786_v20 = vsel %vm75_vm0, %v784_v31, %v785_v42  ;;  %v789_v19 = vsel %vm75_vm0, %v787_v32, %v788_v25  ;;  %v822_v29 = vrot.slane %v802_v18, 2  ;;  %v840_v7 = vmul.f32 %v3247_v2, %v3482_v46 }
  0xc9   :  { %v3553_v44 = vadd.f32 %v3280_v35, %v640_v3  ;;  %v596_v17 = vsel %vm593_vm3, %v590_v53, %v592_v54  ;;  %v604_v15 = vadd.f32 %v592_v54, %v3375_v30  ;;  %v796_v5 = vadd.f32 %v786_v20, %v758_v38 }
  0xca   :  { %v603_v48 = vadd.f32 %v596_v17, %v3431_v39  ;;  %v797_v59 = vadd.f32 %v789_v19, %v759_v61  ;;  %v823_v43 = vrot.slane %v806_v33, 2  ;;  %v825_v57 = vrot.slane %v803_v4, 2 }
  0xcb   :  { %v638_v52 = vadd.f32 %v3455_v21, %v604_v15  ;;  %v826_v49 = vrot.slane %v807_v14, 2  ;;  %v841_v27 = vmul.f32 %v3212_v0, %v3482_v46  ;;  %v850_v35 = vmul.f32 %v3247_v2, %v3485_v12 }
  0xcc   :  { %v637_v30 = vadd.f32 %v3455_v21, %v603_v48  ;;  %v824_v39 = vsel %vm114_vm1, %v822_v29, %v823_v43  ;;  %v851_v38 = vmul.f32 %v3212_v0, %v3485_v12  ;;  %v854_v53 = vmul.f32 %v3259_v28, %v3485_v12 }
  0xcd   :  { %v642_v61 = vmax.f32 %v638_v52, 0.0  ;;  %v827_v1 = vsel %vm114_vm1, %v825_v57, %v826_v49  ;;  %v834_v50 = vadd.f32 %v824_v39, %v796_v5  ;;  %v855_v31 = vmul.f32 %v3224_v62, %v3485_v12 }
  0xce   :  { %v641_v32 = vmax.f32 %v637_v30, 0.0  ;;  %v835_v18 = vadd.f32 %v827_v1, %v797_v59  ;;  %v870_v42 = vrot.slane %v850_v35, 1  ;;  %v871_v25 = vrot.slane %v854_v53, 1 }
  0xcf   :  { %v3577_v3 = vadd.f32 %v3271_v41, %v642_v61  ;;  %v586_v4 = vpop.permute.xlu1 %585  ;;  %v844_v33 = vadd.f32 %v840_v7, %v834_v50  ;;  %v873_v14 = vrot.slane %v851_v38, 1  ;;  %v874_v54 = vrot.slane %v855_v31, 1 }
  0xd0   :  { %v3580_v20 = vadd.f32 %v3284_v26, %v641_v32  ;;  %v594_v19 = vsel %vm593_vm3, %v586_v4, %v3501_v11  ;;  %v845_v29 = vadd.f32 %v841_v27, %v835_v18  ;;  %v872_v17 = vsel %vm75_vm0, %v870_v42, %v871_v25 }
  0xd1   :  { %v601_v41 = vadd.f32 %v594_v19, %v3519_v45  ;;  %v875_v7 = vsel %vm75_vm0, %v873_v14, %v874_v54  ;;  %v882_v15 = vadd.f32 %v872_v17, %v844_v33  ;;  %v888_v26 = vmul.f32 %v3247_v2, %v3496_v10 }
  0xd2   :  { %v883_v5 = vadd.f32 %v875_v7, %v845_v29  ;;  %v889_v11 = vmul.f32 %v3212_v0, %v3496_v10  ;;  %v892_v48 = vmul.f32 %v3259_v28, %v3496_v10  ;;  %v893_v59 = vmul.f32 %v3224_v62, %v3496_v10 }
  0xd3   :  { %v635_v43 = vadd.f32 %v3455_v21, %v601_v41  ;;  %v908_v57 = vrot.slane %v888_v26, 2  ;;  %v3601_v45 = vstv %s3563_s2  ;;  %v3604_v52 = vstv %s3565_s8 }
  0xd4   :  { %v909_v49 = vrot.slane %v892_v48, 2  ;;  %v911_v27 = vrot.slane %v889_v11, 2  ;;  %v912_v35 = vrot.slane %v893_v59, 2  ;;  %v1435_v0 = vmul.f32 %v3137_v51, %v3601_v45 }
  0xd5   :  { %v639_v30 = vmax.f32 %v635_v43, 0.0  ;;  %v1436_v62 = vmul.f32 %v3231_v60, %v3601_v45  ;;  %v1441_v21 = vmul.f32 %v3137_v51, %v3604_v52  ;;  %v1442_v39 = vmul.f32 %v3231_v60, %v3604_v52 }
  0xd6   :  { %v910_v38 = vsel %vm114_vm1, %v908_v57, %v909_v49  ;;  %v913_v53 = vsel %vm114_vm1, %v911_v27, %v912_v35  ;;  %v1445_v61 = vmul.f32 %v3144_v9, %v3604_v52  ;;  %v1446_v1 = vmul.f32 %v3240_v24, %v3604_v52 }
  0xd7   :  { %v3624_v50 = vpop.permute.xlu0 %1098  ;;  %v3626_v31 = vadd.f32 %v910_v38, %v882_v15  ;;  %v3628_v32 = vadd.f32 %v913_v53, %v883_v5  ;;  %v1459_v18 = vrot.slane %v1441_v21, 1  ;;  %v1462_v42 = vrot.slane %v1442_v39, 1 }
  0xd8   :  { %v1460_v25 = vrot.slane %v1445_v61, 1  ;;  %v1463_v4 = vrot.slane %v1446_v1, 1  ;;  %v3631_v33 = vstv %s3585_s9  ;;  %v3634_v14 = vstv %s3587_s10 }
  0xd9   :  { %v1479_v54 = vmul.f32 %v3137_v51, %v3631_v33  ;;  %v1480_v19 = vmul.f32 %v3231_v60, %v3631_v33  ;;  %v1483_v29 = vmul.f32 %v3144_v9, %v3631_v33  ;;  %v1484_v17 = vmul.f32 %v3240_v24, %v3631_v33 }
  0xda   :  { %v1461_v41 = vsel %vm75_vm0, %v1459_v18, %v1460_v25  ;;  %v1464_v7 = vsel %vm75_vm0, %v1462_v42, %v1463_v4  ;;  %v1517_v15 = vmul.f32 %v3156_v34, %v3634_v14  ;;  %v1518_v26 = vmul.f32 %v3247_v2, %v3634_v14 }
  0xdb   :  { %v1473_v5 = vadd.f32 %v1461_v41, %v1435_v0  ;;  %v1474_v11 = vadd.f32 %v1464_v7, %v1436_v62  ;;  %v1497_v48 = vrot.slane %v1479_v54, 2  ;;  %v1498_v59 = vrot.slane %v1483_v29, 2 }
  0xdc   :  { %v1500_v43 = vrot.slane %v1480_v19, 2  ;;  %v1501_v57 = vrot.slane %v1484_v17, 2  ;;  %v3651_v49 = vstv %s3606_s11  ;;  %v3654_v27 = vstv %s3610_s12 }
  0xdd   :  { %v3660_v35 = vpop.permute.xlu1 %1096  ;;  %v664_v21 = vpop.permute.xlu0 %663  ;;  %v1499_v39 = vsel %vm114_vm1, %v1497_v48, %v1498_v59  ;;  %v1527_v0 = vmul.f32 %v3156_v34, %v3651_v49  ;;  %v1528_v62 = vmul.f32 %v3247_v2, %v3651_v49  ;;  %v1531_v38 = vmul.f32 %v3163_v13, %v3651_v49 }
  0xde   :  { %v1103_v53 = vsel %vm401_vm2, %v3660_v35, %v3624_v50  ;;  %v671_v61 = vsel %vm401_vm2, %v664_v21, %v3200_v56  ;;  %v1502_v1 = vsel %vm114_vm1, %v1500_v43, %v1501_v57  ;;  %v1511_v18 = vadd.f32 %v1499_v39, %v1473_v5 }
  0xdf   :  { %v3680_v42 = vadd.f32 %v1103_v53, %v3537_v22  ;;  %v678_v25 = vadd.f32 %v671_v61, %v639_v30  ;;  %v1512_v4 = vadd.f32 %v1502_v1, %v1474_v11  ;;  %v1532_v54 = vmul.f32 %v3259_v28, %v3651_v49 }
  0xe0   :  { %v1521_v19 = vadd.f32 %v1517_v15, %v1511_v18  ;;  %v1545_v29 = vrot.slane %v1527_v0, 1  ;;  %v1546_v17 = vrot.slane %v1531_v38, 1  ;;  %v1548_v41 = vrot.slane %v1528_v62, 1 }
  0xe1   :  { %v684_v7 = vadd.f32 %v3506_v36, %v678_v25  ;;  %v1522_v48 = vadd.f32 %v1518_v26, %v1512_v4  ;;  %v1549_v56 = vrot.slane %v1532_v54, 1  ;;  %v1565_v22 = vmul.f32 %v3156_v34, %v3654_v27 }
  0xe2   :  { %v1547_v30 = vsel %vm75_vm0, %v1545_v29, %v1546_v17  ;;  %v1566_v5 = vmul.f32 %v3247_v2, %v3654_v27  ;;  %v1569_v15 = vmul.f32 %v3163_v13, %v3654_v27  ;;  %v1570_v11 = vmul.f32 %v3259_v28, %v3654_v27 }
  0xe3   :  { %v3695_v26 = vmul.f32 %v3540_v63, %v684_v7  ;;  %v1550_v59 = vsel %vm75_vm0, %v1548_v41, %v1549_v56  ;;  %v1559_v43 = vadd.f32 %v1547_v30, %v1521_v19  ;;  %v1583_v57 = vrot.slane %v1565_v22, 2 }
  0xe4   :  { %v1560_v21 = vadd.f32 %v1550_v59, %v1522_v48  ;;  %v1584_v39 = vrot.slane %v1569_v15, 2  ;;  %v1586_v0 = vrot.slane %v1566_v5, 2  ;;  %v1587_v62 = vrot.slane %v1570_v11, 2 }
  0xe5   :  { %v3699_v38 = vstv %s3656_s13  ;;  %v3702_v53 = vstv %s3658_s14  ;;  %v3705_v61 = vstv %s3669_s15  ;;  %v3708_v1 = vstv %s3671_s16 }
  0xe6   :  { %v1101_v18 = vpop.permute.xlu1 %1100  ;;  %v1585_v25 = vsel %vm114_vm1, %v1583_v57, %v1584_v39  ;;  %v1588_v4 = vsel %vm114_vm1, %v1586_v0, %v1587_v62  ;;  %v1603_v54 = vmul.f32 %v3137_v51, %v3699_v38  ;;  %v1604_v19 = vmul.f32 %v3231_v60, %v3699_v38 }
  0xe7   :  { %v1104_v29 = vsel %vm401_vm2, %v3624_v50, %v1101_v18  ;;  %v3719_v17 = vadd.f32 %v1101_v18, %v3628_v32  ;;  %v1597_v41 = vadd.f32 %v1585_v25, %v1559_v43  ;;  %v1598_v7 = vadd.f32 %v1588_v4, %v1560_v21 }
  0xe8   :  { %v3722_v48 = vadd.f32 %v1104_v29, %v3626_v31  ;;  %v1607_v56 = vmul.f32 %v3144_v9, %v3699_v38  ;;  %v1608_v51 = vmul.f32 %v3240_v24, %v3699_v38  ;;  %v1613_v60 = vmul.f32 %v3156_v34, %v3702_v53 }
  0xe9   :  { %v1614_v50 = vmul.f32 %v3247_v2, %v3702_v53  ;;  %v1617_v32 = vmul.f32 %v3163_v13, %v3702_v53  ;;  %v1618_v22 = vmul.f32 %v3259_v28, %v3702_v53  ;;  %v1631_v31 = vadd.f32 %v3705_v61, %v1597_v41 }
  0xea   :  { %v1621_v30 = vadd.f32 %v1613_v60, %v1603_v54  ;;  %v1632_v9 = vadd.f32 %v3705_v61, %v1598_v7  ;;  %v756_v24 = vmul.f32 %v3440_v8, %v3459_v16  ;;  %v762_v34 = vmul.f32 %v3440_v8, %v3462_v37 }
  0xeb   :  { %v1622_v5 = vadd.f32 %v1614_v50, %v1604_v19  ;;  %v1625_v15 = vadd.f32 %v1617_v32, %v1607_v56  ;;  %v1626_v2 = vadd.f32 %v1618_v22, %v1608_v51  ;;  %v1635_v11 = vmax.f32 %v1631_v31, 0.0 }
  0xec   :  { %v1636_v13 = vmax.f32 %v1632_v9, 0.0  ;;  %v1649_v59 = vrot.slane %v1621_v30, 1  ;;  %v766_v28 = vmul.f32 %v3398_v6, %v3462_v37  ;;  %v778_v43 = vrot.slane %v762_v34, 1 }
  0xed   :  { %v1650_v57 = vrot.slane %v1625_v15, 1  ;;  %v1652_v21 = vrot.slane %v1622_v5, 1  ;;  %v1653_v39 = vrot.slane %v1626_v2, 1  ;;  %v800_v16 = vmul.f32 %v3440_v8, %v3465_v40 }
  0xee   :  { %v779_v0 = vrot.slane %v766_v28, 1  ;;  %v804_v62 = vmul.f32 %v3398_v6, %v3465_v40  ;;  %v838_v18 = vmul.f32 %v3412_v47, %v3482_v46  ;;  %v848_v25 = vmul.f32 %v3412_v47, %v3485_v12 }
  0xef   :  { %v1651_v37 = vsel %vm75_vm0, %v1649_v59, %v1650_v57  ;;  %v1654_v4 = vsel %vm75_vm0, %v1652_v21, %v1653_v39  ;;  %v816_v54 = vrot.slane %v800_v16, 2  ;;  %v852_v19 = vmul.f32 %v3422_v55, %v3485_v12 }
  0xf0   :  { %v1663_v29 = vadd.f32 %v1651_v37, %v1635_v11  ;;  %v1664_v41 = vadd.f32 %v1654_v4, %v1636_v13  ;;  %v780_v40 = vsel %vm75_vm0, %v778_v43, %v779_v0  ;;  %v817_v7 = vrot.slane %v804_v62, 2 }
  0xf1   :  { %v794_v46 = vadd.f32 %v780_v40, %v756_v24  ;;  %v864_v56 = vrot.slane %v848_v25, 1  ;;  %v865_v51 = vrot.slane %v852_v19, 1  ;;  %v886_v60 = vmul.f32 %v3412_v47, %v3496_v10 }
  0xf2   :  { %v1669_v50 = vadd.f32 %v3708_v1, %v1663_v29  ;;  %v1670_v32 = vadd.f32 %v3708_v1, %v1664_v41  ;;  %v818_v22 = vsel %vm114_vm1, %v816_v54, %v817_v7  ;;  %v890_v12 = vmul.f32 %v3422_v55, %v3496_v10 }
  0xf3   :  { %v832_v31 = vadd.f32 %v818_v22, %v794_v46  ;;  %v866_v30 = vsel %vm75_vm0, %v864_v56, %v865_v51  ;;  %v902_v9 = vrot.slane %v886_v60, 2  ;;  %v3770_v24 = vstv %s3742_s17 }
  0xf4   :  { %v2341_v34 = vpack.i.bf16 %v1670_v32, %v1669_v50  ;;  %v903_v5 = vrot.slane %v890_v12, 2  ;;  %v685_v15 = vadd.f32 %v3506_v36, %v3553_v44  ;;  %v686_v2 = vadd.f32 %v3506_v36, %v3580_v20  ;;  %v3788_v20 = vpop.permute.xlu0 %1287 }
  0xf5   :  { %v842_v11 = vadd.f32 %v838_v18, %v832_v31  ;;  %v1095_v13 = vpop.permute.xlu1 %1094  ;;  %v695_v59 = vsub.s32 1, %v3515_v58  ;;  %v699_v10 = vsub.s32 2, %v3515_v58  ;;  %v687_v28 = vadd.f32 %v3506_v36, %v3577_v3 }
  0xf6   :  { %2342 = vrot.lane.b32.xlu0 %v2341_v34, %s2471_s18  ;;  %v904_v43 = vsel %vm114_vm1, %v902_v9, %v903_v5  ;;  %v1102_v57 = vsel %vm401_vm2, %v1095_v13, %v3660_v35  ;;  %v703_v44 = vsub.s32 3, %v3515_v58  ;;  %v3786_v21 = vstv %s3754_s19 }
  0xf7   :  { %v880_v39 = vadd.f32 %v866_v30, %v842_v11  ;;  %v3791_v16 = vrot.slane %v3533_v23, %v695_v59  ;;  %v3794_v0 = vrot.slane %v3533_v23, %v699_v10  ;;  %v1434_v36 = vmul.f32 %v3440_v8, %v3601_v45 }
  0xf8   :  { %v3799_v3 = vrot.slane %v3533_v23, %v703_v44  ;;  %v1440_v58 = vmul.f32 %v3440_v8, %v3604_v52  ;;  %v1444_v35 = vmul.f32 %v3398_v6, %v3604_v52  ;;  %v1478_v62 = vmul.f32 %v3440_v8, %v3631_v33 }
  0xf9   :  { %v918_v18 = vadd.f32 %v904_v43, %v880_v39  ;;  %v3808_v25 = vmul.f32 %v3791_v16, %v685_v15  ;;  %v3811_v37 = vmul.f32 %v3794_v0, %v686_v2  ;;  %v1482_v23 = vmul.f32 %v3398_v6, %v3631_v33 }
  0xfa   :  { %v712_v4 = vmul.f32 %v3799_v3, %v687_v28  ;;  %v1456_v54 = vrot.slane %v1440_v58, 1  ;;  %v1457_v19 = vrot.slane %v1444_v35, 1  ;;  %v1494_v29 = vrot.slane %v1478_v62, 2 }
  0xfb   :  { %v3818_v41 = vadd.f32 %v1102_v57, %v918_v18  ;;  %v2346_v40 = vpack.i.bf16 %v3811_v37, %v3808_v25  ;;  %v1495_v7 = vrot.slane %v1482_v23, 2  ;;  %v1516_v51 = vmul.f32 %v3412_v47, %v3634_v14 }
  0xfc   :  { %v2351_v46 = vpack.i.bf16 %v712_v4, %v3695_v26  ;;  %v1458_v56 = vsel %vm75_vm0, %v1456_v54, %v1457_v19  ;;  %v1526_v22 = vmul.f32 %v3412_v47, %v3651_v49  ;;  %v1530_v12 = vmul.f32 %v3422_v55, %v3651_v49 }
  0xfd   :  { %v1292_v60 = vpop.permute.xlu0 %1291  ;;  %2347 = vrot.lane.b32.xlu0 %v2346_v40, %s2470_s28  ;;  %v1472_v50 = vadd.f32 %v1458_v56, %v1434_v36  ;;  %v1496_v32 = vsel %vm114_vm1, %v1494_v29, %v1495_v7  ;;  %v1564_v30 = vmul.f32 %v3412_v47, %v3654_v27  ;;  %v1568_v9 = vmul.f32 %v3422_v55, %v3654_v27 }
  0xfe   :  { %v1303_v31 = vadd.f32 %v1292_v60, %v3719_v17  ;;  %2352 = vrot.lane.b32.xlu1 %v2351_v46, %s2470_s28  ;;  %v1602_v34 = vmul.f32 %v3440_v8, %v3699_v38  ;;  %v1542_v15 = vrot.slane %v1526_v22, 1  ;;  %v1543_v2 = vrot.slane %v1530_v12, 1 }
  0xff   :  { %v1510_v5 = vadd.f32 %v1496_v32, %v1472_v50  ;;  %v1606_v11 = vmul.f32 %v3398_v6, %v3699_v38  ;;  %v1580_v13 = vrot.slane %v1564_v30, 2  ;;  %v1581_v59 = vrot.slane %v1568_v9, 2 }
 0x100   :  { %v3847_v17 = vadd.f32 %v3770_v24, %v1303_v31  ;;  %v1612_v10 = vmul.f32 %v3412_v47, %v3702_v53  ;;  %v1544_v43 = vsel %vm75_vm0, %v1542_v15, %v1543_v2  ;;  %v1616_v57 = vmul.f32 %v3422_v55, %v3702_v53 }
 0x101   :  { %2357 = vrot.lane.b32.xlu0 %v2346_v40, %s2471_s18  ;;  %v1520_v28 = vadd.f32 %v1516_v51, %v1510_v5  ;;  %v3858_v44 = vstv %s3815_s20  ;;  %v1582_v36 = vsel %vm114_vm1, %v1580_v13, %v1581_v59  ;;  %v3870_v4 = vstv %s3822_s21 }
 0x102   :  { %2362 = vrot.lane.b32.xlu1 %v2351_v46, %s2471_s18  ;;  %v1341_v39 = vmax.f32 %v3847_v17, 0.0  ;;  %v1620_v58 = vadd.f32 %v1612_v10, %v1602_v34  ;;  %v1695_v35 = vmul.f32 %v3440_v8, %v3858_v44  ;;  %v1624_v23 = vadd.f32 %v1616_v57, %v1606_v11 }
 0x103   :  { %v1290_v62 = vpop.permute.xlu1 %1289  ;;  %v1558_v18 = vadd.f32 %v1544_v43, %v1520_v28  ;;  %v3873_v54 = vstv %s3824_s22  ;;  %v1701_v7 = vmul.f32 %v3440_v8, %v3870_v4  ;;  %v3886_v32 = vpop.permute.xlu0 %1364  ;;  %v3899_v2 = vstv %s3851_s23 }
 0x104   :  { %v1294_v19 = vsel %vm593_vm3, %v3788_v20, %v1290_v62  ;;  %v1295_v29 = vsel %vm593_vm3, %v1290_v62, %v1292_v60  ;;  %v1646_v40 = vrot.slane %v1620_v58, 1  ;;  %v1647_v50 = vrot.slane %v1624_v23, 1 }
 0x105   :  { %v1301_v46 = vadd.f32 %v1294_v19, %v3680_v42  ;;  %v1302_v56 = vadd.f32 %v1295_v29, %v3722_v48  ;;  %v1596_v51 = vadd.f32 %v1582_v36, %v1558_v18  ;;  %v1705_v60 = vmul.f32 %v3398_v6, %v3870_v4 }
 0x106   :  { %v1717_v22 = vrot.slane %v1701_v7, 1  ;;  %v1739_v12 = vmul.f32 %v3440_v8, %v3873_v54  ;;  %v1743_v31 = vmul.f32 %v3398_v6, %v3873_v54  ;;  %v1648_v9 = vsel %vm75_vm0, %v1646_v40, %v1647_v50 }
 0x107   :  { %v1335_v42 = vadd.f32 %v3770_v24, %v1301_v46  ;;  %v1336_v48 = vadd.f32 %v3770_v24, %v1302_v56  ;;  %v1630_v30 = vadd.f32 %v3705_v61, %v1596_v51  ;;  %v1718_v34 = vrot.slane %v1705_v60, 1 }
 0x108   :  { %v1755_v5 = vrot.slane %v1739_v12, 2  ;;  %v1756_v15 = vrot.slane %v1743_v31, 2  ;;  %v1777_v59 = vmul.f32 %v3412_v47, %v3899_v2  ;;  %v3906_v43 = vstv %s3865_s24 }
 0x109   :  { %v1339_v11 = vmax.f32 %v1335_v42, 0.0  ;;  %v1340_v17 = vmax.f32 %v1336_v48, 0.0  ;;  %v1634_v13 = vmax.f32 %v1630_v30, 0.0  ;;  %v1719_v10 = vsel %vm75_vm0, %v1717_v22, %v1718_v34 }
 0x10a   :  { %v1757_v28 = vsel %vm114_vm1, %v1755_v5, %v1756_v15  ;;  %v3909_v57 = vstv %s3867_s25  ;;  %v1733_v58 = vadd.f32 %v1719_v10, %v1695_v35  ;;  %v1787_v62 = vmul.f32 %v3412_v47, %v3906_v43 }
 0x10b   :  { %v1662_v36 = vadd.f32 %v1648_v9, %v1634_v13  ;;  %v1791_v18 = vmul.f32 %v3422_v55, %v3906_v43  ;;  %v1825_v29 = vmul.f32 %v3412_v47, %v3909_v57  ;;  %v1829_v40 = vmul.f32 %v3422_v55, %v3909_v57 }
 0x10c   :  { %v1286_v23 = vpop.permute.xlu1 %1285  ;;  %v1369_v19 = vpop.permute.xlu0 %1368  ;;  %v3922_v7 = vstv %s3880_s26  ;;  %v3925_v46 = vstv %s3882_s1  ;;  %v1771_v50 = vadd.f32 %v1757_v28, %v1733_v58  ;;  %v1803_v22 = vrot.slane %v1787_v62, 1 }
 0x10d   :  { %v1293_v35 = vsel %vm593_vm3, %v1286_v23, %v3788_v20  ;;  %v1380_v56 = vadd.f32 %v1369_v19, %v1341_v39  ;;  %v3932_v51 = vadd.f32 %v3708_v1, %v1662_v36  ;;  %v1804_v12 = vrot.slane %v1791_v18, 1 }
 0x10e   :  { %v1300_v60 = vadd.f32 %v1293_v35, %v3818_v41  ;;  %v1841_v31 = vrot.slane %v1825_v29, 2  ;;  %v1781_v48 = vadd.f32 %v1777_v59, %v1771_v50  ;;  %v1842_v30 = vrot.slane %v1829_v40, 2 }
 0x10f   :  { %v1386_v42 = vadd.f32 %v3786_v21, %v1380_v56  ;;  %v1863_v9 = vmul.f32 %v3440_v8, %v3922_v7  ;;  %v1805_v39 = vsel %vm75_vm0, %v1803_v22, %v1804_v12  ;;  %v1867_v5 = vmul.f32 %v3398_v6, %v3922_v7  ;;  %v3978_v22 = vld [vmem:[%s4222_s0 + $0x10] sm:$0xff] }
 0x110   :  { %v1334_v34 = vadd.f32 %v3770_v24, %v1300_v60  ;;  %v1367_v20 = vpop.permute.xlu1 %1366  ;;  %v1873_v41 = vmul.f32 %v3412_v47, %v3925_v46  ;;  %v1819_v59 = vadd.f32 %v1805_v39, %v1781_v48  ;;  %v1843_v36 = vsel %vm114_vm1, %v1841_v31, %v1842_v30  ;;  %v3992_v30 = vld [vmem:[%s4222_s0 + $0x28] sm:$0x3] }
 0x111   :  { %v1390_v15 = vmul.f32 %v1386_v42, %v3799_v3  ;;  %v1371_v13 = vsel %vm401_vm2, %v3886_v32, %v1367_v20  ;;  %v1372_v8 = vsel %vm401_vm2, %v1367_v20, %v1369_v19  ;;  %v1877_v6 = vmul.f32 %v3422_v55, %v3925_v46  ;;  %v4000_v20 = vld [vmem:[%s4222_s0 + $0x30] sm:$0x3] }
 0x112   :  { %v1378_v24 = vadd.f32 %v1371_v13, %v1339_v11  ;;  %v1379_v10 = vadd.f32 %v1372_v8, %v1340_v17  ;;  %v1338_v28 = vmax.f32 %v1334_v34, 0.0  ;;  %v1857_v58 = vadd.f32 %v1843_v36, %v1819_v59  ;;  %v3962_v11 = vld [vmem:[%s4222_s0 + $0x8] sm:$0xff] }
 0x113   :  { %v1881_v62 = vadd.f32 %v1873_v41, %v1863_v9  ;;  %v3952_v47 = vstv %s3915_s27  ;;  %v3957_v29 = vstv %s3927_s29  ;;  %v1696_v17 = vmul.f32 %v3962_v11, %v3858_v44 }
 0x114   :  { %v1384_v3 = vadd.f32 %v3786_v21, %v1378_v24  ;;  %v1385_v18 = vadd.f32 %v3786_v21, %v1379_v10  ;;  %v1363_v23 = vpop.permute.xlu1 %1362  ;;  %v1885_v19 = vadd.f32 %v1877_v6, %v1867_v5  ;;  %v1891_v40 = vadd.f32 %v3952_v47, %v1857_v58 }
 0x115   :  { %v1370_v55 = vsel %vm401_vm2, %v1363_v23, %v3886_v32  ;;  %v1907_v35 = vrot.slane %v1881_v62, 1  ;;  %v1697_v12 = vmul.f32 %v3978_v22, %v3858_v44  ;;  %v1702_v42 = vmul.f32 %v3962_v11, %v3870_v4 }
 0x116   :  { %v3970_v56 = vmul.f32 %v1384_v3, %v3791_v16  ;;  %v3973_v50 = vmul.f32 %v1385_v18, %v3794_v0  ;;  %v1377_v60 = vadd.f32 %v1370_v55, %v1338_v28  ;;  %v1895_v32 = vmax.f32 %v1891_v40, 0.0 }
 0x117   :  { %v1908_v31 = vrot.slane %v1885_v19, 1  ;;  %v1703_v16 = vmul.f32 %v3978_v22, %v3870_v4  ;;  %v1706_v9 = vmul.f32 %v3992_v30, %v3870_v4  ;;  %v1720_v39 = vrot.slane %v1702_v42, 1 }
 0x118   :  { %v1383_v0 = vadd.f32 %v3786_v21, %v1377_v60  ;;  %v2366_v48 = vpack.i.bf16 %v3973_v50, %v3970_v56  ;;  %v1707_v21 = vmul.f32 %v4000_v20, %v3870_v4  ;;  %v1740_v59 = vmul.f32 %v3962_v11, %v3873_v54  ;;  %v2423_v60 = vld [vmem:[%s4222_s0 + $0x48] sm:$0xff] }
 0x119   :  { %v1909_v34 = vsel %vm75_vm0, %v1907_v35, %v1908_v31  ;;  %v1723_v5 = vrot.slane %v1703_v16, 1  ;;  %v1721_v8 = vrot.slane %v1706_v9, 1  ;;  %v1741_v10 = vmul.f32 %v3978_v22, %v3873_v54 }
 0x11a   :  { %v4005_v41 = vmul.f32 %v1383_v0, %v3540_v63  ;;  %2367 = vrot.lane.b32.xlu0 %v2366_v48, %s2470_s28  ;;  %2372 = vrot.lane.b32.xlu1 %v2366_v48, %s2471_s18  ;;  %v1923_v13 = vadd.f32 %v1909_v34, %v1895_v32  ;;  %v1724_v24 = vrot.slane %v1707_v21, 1  ;;  %v1744_v28 = vmul.f32 %v3992_v30, %v3873_v54  ;;  %v2425_v0 = vld [vmem:[%s4222_s0 + $0x68] sm:$0x3]  ;;  %v2426_v34 = vld [vmem:[%s4222_s0 + $0x70] sm:$0x3] }
 0x11b   :  { %v1745_v63 = vmul.f32 %v4000_v20, %v3873_v54  ;;  %v1722_v6 = vsel %vm75_vm0, %v1720_v39, %v1721_v8  ;;  %v1758_v18 = vrot.slane %v1740_v59, 2  ;;  %v1761_v40 = vrot.slane %v1741_v10, 2 }
 0x11c   :  { %v2376_v36 = vpack.i.bf16 %v1390_v15, %v4005_v41  ;;  %v1929_v58 = vadd.f32 %v3957_v29, %v1923_v13  ;;  %v1725_v62 = vsel %vm75_vm0, %v1723_v5, %v1724_v24  ;;  %v1734_v3 = vadd.f32 %v1722_v6, %v1696_v17  ;;  %v2424_v17 = vld [vmem:[%s4222_s0 + $0x50] sm:$0xff] }
 0x11d   :  { %v1759_v23 = vrot.slane %v1744_v28, 2  ;;  %v1735_v19 = vadd.f32 %v1725_v62, %v1697_v12  ;;  %v1762_v35 = vrot.slane %v1745_v63, 2  ;;  %v1778_v32 = vmul.f32 %v2423_v60, %v3899_v2 }
 0x11e   :  { %2377 = vrot.lane.b32.xlu0 %v2376_v36, %s2470_s28  ;;  %2382 = vrot.lane.b32.xlu1 %v2376_v36, %s2471_s18  ;;  %v2391_v55 = vpack.i.bf16 %v1929_v58, %v3932_v51  ;;  %v1779_v31 = vmul.f32 %v2424_v17, %v3899_v2  ;;  %v1788_v42 = vmul.f32 %v2423_v60, %v3906_v43 }
 0x11f   :  { %v1760_v15 = vsel %vm114_vm1, %v1758_v18, %v1759_v23  ;;  %v1763_v51 = vsel %vm114_vm1, %v1761_v40, %v1762_v35  ;;  %v1789_v16 = vmul.f32 %v2424_v17, %v3906_v43  ;;  %v1792_v48 = vmul.f32 %v2425_v0, %v3906_v43 }
 0x120   :  { %v1772_v12 = vadd.f32 %v1760_v15, %v1734_v3  ;;  %v1773_v9 = vadd.f32 %v1763_v51, %v1735_v19  ;;  %v1793_v21 = vmul.f32 %v2426_v34, %v3906_v43  ;;  %v1806_v39 = vrot.slane %v1788_v42, 1 }
 0x121   :  { %v1826_v5 = vmul.f32 %v2423_v60, %v3909_v57  ;;  %v1807_v8 = vrot.slane %v1792_v48, 1  ;;  %v1809_v59 = vrot.slane %v1789_v16, 1  ;;  %v1827_v24 = vmul.f32 %v2424_v17, %v3909_v57 }
 0x122   :  { %2392 = vrot.lane.b32.xlu0 %v2391_v55, %s2471_s18  ;;  %v1782_v13 = vadd.f32 %v1778_v32, %v1772_v12  ;;  %v1783_v10 = vadd.f32 %v1779_v31, %v1773_v9  ;;  %v1810_v28 = vrot.slane %v1793_v21, 1  ;;  %v1830_v63 = vmul.f32 %v2425_v0, %v3909_v57 }
 0x123   :  { %v1831_v36 = vmul.f32 %v2426_v34, %v3909_v57  ;;  %v1808_v58 = vsel %vm75_vm0, %v1806_v39, %v1807_v8  ;;  %v1844_v6 = vrot.slane %v1826_v5, 2  ;;  %v1847_v62 = vrot.slane %v1827_v24, 2  ;;  %v4079_v8 = vld [vmem:[%s4222_s0 + $0x38] sm:$0x3] }
 0x124   :  { %v1864_v3 = vmul.f32 %v3962_v11, %v3922_v7  ;;  %v1811_v18 = vsel %vm75_vm0, %v1809_v59, %v1810_v28  ;;  %v1820_v23 = vadd.f32 %v1808_v58, %v1782_v13  ;;  %v1845_v55 = vrot.slane %v1830_v63, 2 }
 0x125   :  { %v1848_v19 = vrot.slane %v1831_v36, 2  ;;  %v1821_v40 = vadd.f32 %v1811_v18, %v1783_v10  ;;  %v1865_v35 = vmul.f32 %v3978_v22, %v3922_v7  ;;  %v1868_v15 = vmul.f32 %v3992_v30, %v3922_v7  ;;  %v4068_v30 = vld [vmem:[%s4222_s0 + $0x18] sm:$0xff] }
 0x126   :  { %v1869_v32 = vmul.f32 %v4000_v20, %v3922_v7  ;;  %v1846_v31 = vsel %vm114_vm1, %v1844_v6, %v1845_v55  ;;  %v1874_v11 = vmul.f32 %v2423_v60, %v3925_v46  ;;  %v1875_v51 = vmul.f32 %v2424_v17, %v3925_v46  ;;  %v2430_v55 = vld [vmem:[%s4222_s0 + $0x78] sm:$0x3] }
 0x127   :  { %v1849_v42 = vsel %vm114_vm1, %v1847_v62, %v1848_v19  ;;  %v1858_v12 = vadd.f32 %v1846_v31, %v1820_v23  ;;  %v1878_v48 = vmul.f32 %v2425_v0, %v3925_v46  ;;  %v1879_v22 = vmul.f32 %v2426_v34, %v3925_v46  ;;  %v2429_v62 = vld [vmem:[%s4222_s0 + $0x58] sm:$0xff] }
 0x128   :  { %v1859_v16 = vadd.f32 %v1849_v42, %v1821_v40  ;;  %v1882_v9 = vadd.f32 %v1874_v11, %v1864_v3  ;;  %v1883_v21 = vadd.f32 %v1875_v51, %v1865_v35  ;;  %v1437_v20 = vmul.f32 %v4068_v30, %v3601_v45 }
 0x129   :  { %v1443_v60 = vmul.f32 %v4068_v30, %v3604_v52  ;;  %v1886_v17 = vadd.f32 %v1878_v48, %v1868_v15  ;;  %v1887_v39 = vadd.f32 %v1879_v22, %v1869_v32  ;;  %v1892_v5 = vadd.f32 %v3952_v47, %v1858_v12 }
 0x12a   :  { %v1893_v0 = vadd.f32 %v3952_v47, %v1859_v16  ;;  %v1910_v34 = vrot.slane %v1882_v9, 1  ;;  %v1913_v13 = vrot.slane %v1883_v21, 1  ;;  %v1447_v59 = vmul.f32 %v4079_v8, %v3604_v52 }
 0x12b   :  { %v1465_v45 = vrot.slane %v1443_v60, 1  ;;  %v1896_v24 = vmax.f32 %v1892_v5, 0.0  ;;  %v1911_v28 = vrot.slane %v1886_v17, 1  ;;  %v1914_v63 = vrot.slane %v1887_v39, 1 }
 0x12c   :  { %v1897_v10 = vmax.f32 %v1893_v0, 0.0  ;;  %v1466_v36 = vrot.slane %v1447_v59, 1  ;;  %v1481_v58 = vmul.f32 %v4068_v30, %v3631_v33  ;;  %v1485_v6 = vmul.f32 %v4079_v8, %v3631_v33 }
 0x12d   :  { %v1519_v3 = vmul.f32 %v2429_v62, %v3634_v14  ;;  %v1912_v52 = vsel %vm75_vm0, %v1910_v34, %v1911_v28  ;;  %v1915_v18 = vsel %vm75_vm0, %v1913_v13, %v1914_v63  ;;  %v1529_v23 = vmul.f32 %v2429_v62, %v3651_v49 }
 0x12e   :  { %v1533_v19 = vmul.f32 %v2430_v55, %v3651_v49  ;;  %v1924_v40 = vadd.f32 %v1912_v52, %v1896_v24  ;;  %v1925_v33 = vadd.f32 %v1915_v18, %v1897_v10  ;;  %v1467_v35 = vsel %vm75_vm0, %v1465_v45, %v1466_v36 }
 0x12f   :  { %v1503_v15 = vrot.slane %v1481_v58, 2  ;;  %v1475_v32 = vadd.f32 %v1467_v35, %v1437_v20  ;;  %v1504_v31 = vrot.slane %v1485_v6, 2  ;;  %v1551_v14 = vrot.slane %v1529_v23, 1 }
 0x130   :  { %v1552_v42 = vrot.slane %v1533_v19, 1  ;;  %v1930_v11 = vadd.f32 %v3957_v29, %v1924_v40  ;;  %v1931_v51 = vadd.f32 %v3957_v29, %v1925_v33  ;;  %v1567_v12 = vmul.f32 %v2429_v62, %v3654_v27 }
 0x131   :  { %v1571_v16 = vmul.f32 %v2430_v55, %v3654_v27  ;;  %v1505_v48 = vsel %vm114_vm1, %v1503_v15, %v1504_v31  ;;  %v1605_v22 = vmul.f32 %v4068_v30, %v3699_v38  ;;  %v1609_v17 = vmul.f32 %v4079_v8, %v3699_v38 }
 0x132   :  { %v1553_v49 = vsel %vm75_vm0, %v1551_v14, %v1552_v42  ;;  %v2386_v9 = vpack.i.bf16 %v1931_v51, %v1930_v11  ;;  %v1513_v21 = vadd.f32 %v1505_v48, %v1475_v32  ;;  %v1589_v20 = vrot.slane %v1567_v12, 2 }
 0x133   :  { %v1590_v60 = vrot.slane %v1571_v16, 2  ;;  %v1615_v39 = vmul.f32 %v2429_v62, %v3702_v53  ;;  %v1619_v5 = vmul.f32 %v2430_v55, %v3702_v53  ;;  %v1704_v27 = vmul.f32 %v4068_v30, %v3870_v4 }
 0x134   :  { %2387 = vrot.lane.b32.xlu1 %v2386_v9, %s2471_s18  ;;  %v1523_v0 = vadd.f32 %v1519_v3, %v1513_v21  ;;  %v1698_v34 = vmul.f32 %v4068_v30, %v3858_v44  ;;  %v1708_v13 = vmul.f32 %v4079_v8, %v3870_v4  ;;  %v1742_v59 = vmul.f32 %v4068_v30, %v3873_v54 }
 0x135   :  { %v1591_v38 = vsel %vm114_vm1, %v1589_v20, %v1590_v60  ;;  %v1623_v45 = vadd.f32 %v1615_v39, %v1605_v22  ;;  %v1726_v24 = vrot.slane %v1704_v27, 1  ;;  %v1746_v53 = vmul.f32 %v4079_v8, %v3873_v54 }
 0x136   :  { %v1561_v10 = vadd.f32 %v1553_v49, %v1523_v0  ;;  %v1727_v28 = vrot.slane %v1708_v13, 1  ;;  %v1764_v63 = vrot.slane %v1742_v59, 2  ;;  %v1627_v36 = vadd.f32 %v1619_v5, %v1609_v17  ;;  %v1981_v0 = vld [vmem:[%s4226_s4] sm:$0xff] }
 0x137   :  { %v1765_v58 = vrot.slane %v1746_v53, 2  ;;  %v1780_v44 = vmul.f32 %v2429_v62, %v3899_v2  ;;  %v1790_v6 = vmul.f32 %v2429_v62, %v3906_v43  ;;  %v1794_v52 = vmul.f32 %v2430_v55, %v3906_v43 }
 0x138   :  { %v1599_v4 = vadd.f32 %v1591_v38, %v1561_v10  ;;  %v1728_v3 = vsel %vm75_vm0, %v1726_v24, %v1727_v28  ;;  %v1828_v18 = vmul.f32 %v2429_v62, %v3909_v57  ;;  %v1655_v23 = vrot.slane %v1623_v45, 1 }
 0x139   :  { %v1736_v19 = vadd.f32 %v1728_v3, %v1698_v34  ;;  %v1766_v54 = vsel %vm114_vm1, %v1764_v63, %v1765_v58  ;;  %v1812_v40 = vrot.slane %v1790_v6, 1  ;;  %v1813_v35 = vrot.slane %v1794_v52, 1 }
 0x13a   :  { %v1633_v33 = vadd.f32 %v3705_v61, %v1599_v4  ;;  %v1832_v15 = vmul.f32 %v2430_v55, %v3909_v57  ;;  %v1850_v2 = vrot.slane %v1828_v18, 2  ;;  %v1866_v31 = vmul.f32 %v4068_v30, %v3922_v7 }
 0x13b   :  { %v1774_v32 = vadd.f32 %v1766_v54, %v1736_v19  ;;  %v1870_v43 = vmul.f32 %v4079_v8, %v3922_v7  ;;  %v1876_v14 = vmul.f32 %v2429_v62, %v3925_v46  ;;  %v1656_v42 = vrot.slane %v1627_v36, 1 }
 0x13c   :  { %v1814_v11 = vsel %vm75_vm0, %v1812_v40, %v1813_v35  ;;  %v1851_v51 = vrot.slane %v1832_v15, 2  ;;  %v1880_v12 = vmul.f32 %v2430_v55, %v3925_v46  ;;  %v2472_v49 = vmov 0.0|0.0  }
 0x13d   :  { %v1784_v61 = vadd.f32 %v1780_v44, %v1774_v32  ;;  %v1884_v16 = vadd.f32 %v1876_v14, %v1866_v31  ;;  %2319 = vmatprep.subr.bf16.mxu1 %v2472_v49  ;;  %v1637_v30 = vmax.f32 %v1633_v33, 0.0  ;;  %v1657_v7 = vsel %vm75_vm0, %v1655_v23, %v1656_v42 }
 0x13e   :  { %v1852_v57 = vsel %vm114_vm1, %v1850_v2, %v1851_v51  ;;  %v1888_v48 = vadd.f32 %v1880_v12, %v1870_v43  ;;  %v2473_v21 = vmov 0.0   ;;  %v2475_v34 = vmov 0  }
 0x13f   :  { %v1822_v22 = vadd.f32 %v1814_v11, %v1784_v61  ;;  %v1916_v8 = vrot.slane %v1884_v16, 1  ;;  %2073 = vmatprep.mubr.f32.mxu0 %v2473_v21  ;;  %v1665_v20 = vadd.f32 %v1657_v7, %v1637_v30  ;;  %2294 = vmatprep.mubr.msk.f32.mxu1 %vm2474_vm4, %v2473_v21 }
 0x140   :  { %v1917_v62 = vrot.slane %v1888_v48, 1  ;;  %2401 = vset.pattern.permute.xlu0 %v2475_v34  ;;  %2402 = vset.pattern.permute.xlu1 %v2475_v34  ;;  %v1955_v34 = vld [vmem:[%s4225_s3 + $0x8] sm:$0xff] }
 0x141   :  { %v1860_v9 = vadd.f32 %v1852_v57, %v1822_v22  ;;  %v1671_v17 = vadd.f32 %v3708_v1, %v1665_v20  ;;  %1986 = vperm.xlu0 %2401, %v1981_v0   ;;  %v1983_v1 = vld [vmem:[%s4226_s4 + $0x10] sm:$0xff] }
 0x142   :  { %v1918_v55 = vsel %vm75_vm0, %v1916_v8, %v1917_v62 }
 0x143   :  { %v1894_v46 = vadd.f32 %v3952_v47, %v1860_v9  ;;  %v1982_v47 = vld [vmem:[%s4226_s4 + $0x8] sm:$0xff] }
 0x145   :  { %v1898_v60 = vmax.f32 %v1894_v46, 0.0 }
 0x147   :  { %v1926_v39 = vadd.f32 %v1918_v55, %v1898_v60 }
 0x149   :  { %v1932_v5 = vadd.f32 %v3957_v29, %v1926_v39 }
 0x14b   :  { %v2396_v27 = vpack.i.bf16 %v1932_v5, %v1671_v17 }
 0x14d   :  { %2397 = vrot.lane.b32.xlu1 %v2396_v27, %s2471_s18 }
 0x151   :  { %1991 = vperm.xlu1 %2402, %v1982_v47   ;;  %v1954_v47 = vld [vmem:[%s4225_s3] sm:$0xff] }
 0x155   :  { %1996 = vperm.xlu1 %2402, %v1983_v1   ;;  %v1956_v1 = vld [vmem:[%s4225_s3 + $0x10] sm:$0xff]  ;;  %s2476_s3 = smov [#allocation6]  }
 0x156   :  { %s2186_s11 = sshll.u32 %s2476_s3, 4  ;;  %s2187_s11 = int_to_ptr.vmem [resolvable:$true] %s2186_s11 }
 0x157   :  { %s2443_s12 = scalar_lea.vmem %s2187_s11, 1152  ;;  %p2448_p6 = scmp.lt.s32.totalorder %s2187_s11, %s2187_s11 }
 0x158   :  { %p2444_p5 = scmp.ne.s32.totalorder %s2187_s11, %s2443_s12  ;;  %p2449_p7 = scmp.lt.s32.totalorder %s2443_s12, %s2443_s12 }
 0x15a   :  { %p2450_p8 = por %p2449_p7, %p2448_p6 }
 0x15c   :  { %p2451_p9 = pnand %p2450_p8, %p2444_p5 }
 0x168   :  { %v4158_v29 = vpop.permute.xlu0 %2342 }
 0x169   :  { %v2345_v62 = vunpack.i.h.bf16 %v4158_v29  ;;  %v2344_v9 = vunpack.i.l.bf16 %v4158_v29 }
 0x16b   :  { %v1685_v39 = vsel %vm593_vm3, %v2344_v9, %v2345_v62 }
 0x16f   :  { %v2348_v13 = vpop.permute.xlu0 %2347 }
 0x170   :  { %v2350_v59 = vunpack.i.h.bf16 %v2348_v13  ;;  %v2349_v38 = vunpack.i.l.bf16 %v2348_v13  ;;  %v2353_v45 = vpop.permute.xlu1 %2352 }
 0x171   :  { %v2355_v24 = vunpack.i.h.bf16 %v2353_v45  ;;  %v2354_v53 = vunpack.i.l.bf16 %v2353_v45 }
 0x172   :  { %v729_v10 = vsel %vm401_vm2, %v2349_v38, %v2350_v59 }
 0x173   :  { %v2358_v28 = vpop.permute.xlu0 %2357  ;;  %v2303_v63 = vpack.c.bf16 %v729_v10, %v3808_v25  ;;  %v728_v36 = vsel %vm401_vm2, %v2354_v53, %v2349_v38  ;;  %v730_v58 = vsel %vm401_vm2, %v2350_v59, %v2355_v24 }
 0x174   :  { %v2360_v44 = vunpack.i.h.bf16 %v2358_v28  ;;  %v2359_v6 = vunpack.i.l.bf16 %v2358_v28  ;;  %v2363_v4 = vpop.permute.xlu1 %2362  ;;  %v2305_v3 = vpack.c.bf16 %v728_v36, %v3695_v26  ;;  %v2320_v52 = vpack.c.bf16 %v730_v58, %v3811_v37 }
 0x175   :  { %2304 = vmatprep.subr.bf16.mxu0 %v2303_v63  ;;  %v2365_v18 = vunpack.i.h.bf16 %v2363_v4  ;;  %v2364_v23 = vunpack.i.l.bf16 %v2363_v4 }
 0x176   :  { %2306 = vmatpush1.bf16.msra.mxu0 %v2305_v3  ;;  %2321 = vmatpush3.bf16.msra.mxu1 %v2320_v52  ;;  %v746_v19 = vsel %vm593_vm3, %v2359_v6, %v2360_v44 }
 0x177   :  { %v2307_v25 = vpack.c.bf16 %v3970_v56, %v746_v19  ;;  %2322 = vmatprep.subr.bf16.mxu1 %v2472_v49  ;;  %v745_v54 = vsel %vm593_vm3, %v2364_v23, %v2359_v6  ;;  %v747_v40 = vsel %vm593_vm3, %v2360_v44, %v2365_v18 }
 0x178   :  { %v2309_v33 = vpack.c.bf16 %v4005_v41, %v745_v54  ;;  %v2323_v26 = vpack.c.bf16 %v3973_v50, %v747_v40 }
 0x179   :  { %2308 = vmatprep.subr.bf16.mxu0 %v2307_v25 }
 0x17a   :  { %2310 = vmatpush1.bf16.msra.mxu0 %v2309_v33  ;;  %2324 = vmatpush3.bf16.msra.mxu1 %v2323_v26 }
 0x17b   :  { %2325 = vmatprep.subr.bf16.mxu1 %v2472_v49 }
 0x18c   :  { %v2368_v37 = vpop.permute.xlu0 %2367  ;;  %v2373_v35 = vpop.permute.xlu1 %2372 }
 0x18d   :  { %v2370_v15 = vunpack.i.h.bf16 %v2368_v37  ;;  %v2369_v2 = vunpack.i.l.bf16 %v2368_v37  ;;  %v2375_v56 = vunpack.i.h.bf16 %v2373_v35  ;;  %v2374_v32 = vunpack.i.l.bf16 %v2373_v35 }
 0x18f   :  { %v1407_v31 = vsel %vm401_vm2, %v2369_v2, %v2370_v15  ;;  %v1424_v43 = vsel %vm593_vm3, %v2374_v32, %v2375_v56 }
 0x190   :  { %v2378_v14 = vpop.permute.xlu0 %2377  ;;  %v2383_v42 = vpop.permute.xlu1 %2382  ;;  %v2311_v41 = vpack.c.bf16 %v1424_v43, %v1407_v31 }
 0x191   :  { %v2380_v11 = vunpack.i.h.bf16 %v2378_v14  ;;  %v2379_v50 = vunpack.i.l.bf16 %v2378_v14  ;;  %v2385_v51 = vunpack.i.h.bf16 %v2383_v42  ;;  %v2384_v12 = vunpack.i.l.bf16 %v2383_v42 }
 0x192   :  { %2312 = vmatprep.subr.bf16.mxu0 %v2311_v41 }
 0x193   :  { %v1406_v61 = vsel %vm401_vm2, %v2379_v50, %v2369_v2  ;;  %v1423_v16 = vsel %vm593_vm3, %v2384_v12, %v2374_v32  ;;  %v1408_v57 = vsel %vm401_vm2, %v2370_v15, %v2380_v11  ;;  %v1425_v48 = vsel %vm593_vm3, %v2375_v56, %v2385_v51 }
 0x194   :  { %v2313_v30 = vpack.c.bf16 %v1423_v16, %v1406_v61  ;;  %v2326_v22 = vpack.c.bf16 %v1425_v48, %v1408_v57  ;;  %v2393_v7 = vpop.permute.xlu0 %2392 }
 0x195   :  { %v2394_v8 = vunpack.i.l.bf16 %v2393_v7  ;;  %v2395_v20 = vunpack.i.h.bf16 %v2393_v7 }
 0x196   :  { %2314 = vmatpush1.bf16.msra.mxu0 %v2313_v30  ;;  %2327 = vmatpush3.bf16.msra.mxu1 %v2326_v22 }
 0x197   :  { %2328 = vmatprep.subr.bf16.mxu1 %v2472_v49  ;;  %v1684_v17 = vsel %vm593_vm3, %v2394_v8, %v2344_v9 }
 0x1a6   :  { %v2388_v46 = vpop.permute.xlu1 %2387 }
 0x1a7   :  { %v2390_v55 = vunpack.i.h.bf16 %v2388_v46  ;;  %v2389_v60 = vunpack.i.l.bf16 %v2388_v46 }
 0x1a9   :  { %v1946_v5 = vsel %vm593_vm3, %v2389_v60, %v2390_v55  ;;  %v1945_v27 = vsel %vm593_vm3, %v2395_v20, %v2389_v60 }
 0x1aa   :  { %v2315_v0 = vpack.c.bf16 %v1946_v5, %v1685_v39  ;;  %v2317_v49 = vpack.c.bf16 %v1945_v27, %v1684_v17 }
 0x1ac   :  { %2316 = vmatprep.subr.bf16.mxu0 %v2315_v0 }
 0x1ad   :  { %2318 = vmatpush1.bf16.msra.mxu0 %v2317_v49 }
 0x1b0   :  { %2261 = vmatmul.mubr.msk.f32.vlgmr.msra.gmra.mrb[0].mxu0 %vm1999_vm5, %v1954_v47 }
 0x1b1   :  { %2079 = vmatprep.mubr.f32.mxu0 %v2473_v21 }
 0x1b4   :  { %2262 = vmatmul.mubr.msk.f32.gmra.mrb[2].mxu0 %vm1999_vm5, %v1955_v34 }
 0x1b5   :  { %2085 = vmatprep.mubr.f32.mxu0 %v2473_v21 }
 0x1b8   :  { %2263 = vmatmul.mubr.msk.f32.gmra.mrb[4].mxu0 %vm1999_vm5, %v1956_v1 }
 0x1bf   :  { %v2398_v29 = vpop.permute.xlu1 %2397 }
 0x1c0   :  { %v2400_v13 = vunpack.i.h.bf16 %v2398_v29  ;;  %v2399_v59 = vunpack.i.l.bf16 %v2398_v29  ;;  %v1987_v53 = vpop.permute.xlu0 %1986 }
 0x1c2   :  { %v1686_v38 = vsel %vm593_vm3, %v2345_v62, %v2399_v59  ;;  %v1947_v45 = vsel %vm593_vm3, %v2390_v55, %v2400_v13 }
 0x1c3   :  { %v2329_v24 = vpack.c.bf16 %v1947_v45, %v1686_v38 }
 0x1c5   :  { %2330 = vmatpush3.bf16.msra.mxu1 %v2329_v24 }
 0x1c8   :  { %2295 = vmatmul.mubr.msk.f32.vlgmr.msra.gmra.mrb[0].mxu1 %vm1999_vm5, %v1954_v47 }
 0x1c9   :  { %2297 = vmatprep.mubr.msk.f32.mxu1 %vm2474_vm4, %v2473_v21 }
 0x1cc   :  { %2298 = vmatmul.mubr.msk.f32.gmra.mrb[2].mxu1 %vm1999_vm5, %v1955_v34 }
 0x1cd   :  { %2300 = vmatprep.mubr.msk.f32.mxu1 %vm2474_vm4, %v2473_v21 }
 0x1d0   :  { %2301 = vmatmul.mubr.msk.f32.gmra.mrb[4].mxu1 %vm1999_vm5, %v1956_v1  ;;  %v1992_v28 = vpop.permute.xlu1 %1991 }
 0x1d4   :  { %v1997_v52 = vpop.permute.xlu1 %1996 }
 0x283   :  { %v2075_v10 = vpop.f32.mrb[0].mxu0 }
 0x284   :  { %v2076_v63 = vadd.f32 %v2075_v10, %v1987_v53  ;;  %v2077_v36 = vpop.f32.mrb[1].mxu0 }
 0x285   :  { %v2078_v58 = vadd.f32 %v2077_v36, %v1987_v53 }
 0x286   :  { %2172 = vst [vmem:[#allocation6] sm:$0xff] %v2076_v63 }
 0x287   :  { %2173 = vst [vmem:[#allocation6 + $0x8] sm:$0xff] %v2078_v58  ;;  %v2081_v44 = vpop.f32.mrb[2].mxu0 }
 0x288   :  { %v2082_v6 = vadd.f32 %v2081_v44, %v1992_v28  ;;  %v2083_v4 = vpop.f32.mrb[3].mxu0 }
 0x289   :  { %v2084_v3 = vadd.f32 %v2083_v4, %v1992_v28 }
 0x28a   :  { %2175 = vst [vmem:[#allocation6 + $0x18] sm:$0xff] %v2082_v6 }
 0x28b   :  { %2176 = vst [vmem:[#allocation6 + $0x20] sm:$0xff] %v2084_v3  ;;  %v2087_v18 = vpop.f32.mrb[4].mxu0 }
 0x28c   :  { %v2088_v23 = vadd.f32 %v2087_v18, %v1997_v52  ;;  %v2089_v21 = vpop.f32.mrb[5].mxu0 }
 0x28d   :  { %v2090_v19 = vadd.f32 %v2089_v21, %v1997_v52 }
 0x28e   :  { %2178 = vst [vmem:[#allocation6 + $0x30] sm:$0xff] %v2088_v23 }
 0x28f   :  { %2179 = vst [vmem:[#allocation6 + $0x38] sm:$0xff] %v2090_v19 }
 0x29b   :  { %v2158_v25 = vpop.f32.mrb[0].mxu1 }
 0x29c   :  { %v2159_v54 = vadd.f32 %v2158_v25, %v1987_v53  ;;  %v2296_v40 = vpop.f32.mrb[1].mxu1 }
 0x29e   :  { %2174 = vst [vmem:[#allocation6 + $0x10] sm:$0xff] %v2159_v54 }
 0x29f   :  { %v2163_v33 = vpop.f32.mrb[2].mxu1 }
 0x2a0   :  { %v2164_v26 = vadd.f32 %v2163_v33, %v1992_v28  ;;  %v2299_v37 = vpop.f32.mrb[3].mxu1 }
 0x2a2   :  { %2177 = vst [vmem:[#allocation6 + $0x28] sm:$0xff] %v2164_v26 }
 0x2a3   :  { %v2168_v35 = vpop.f32.mrb[4].mxu1 }
 0x2a4   :  { %v2169_v15 = vadd.f32 %v2168_v35, %v1997_v52  ;;  %v2302_v2 = vpop.f32.mrb[5].mxu1 }
 0x2a6   :  { %2180 = vst [vmem:[#allocation6 + $0x40] sm:$0xff] %v2169_v15 }
 0x2a7   :  { %2454 = shalt.err (!%p2451_p9)
}
 0x2a8   :  { %s2455_s15 = scalar_lea.hbm %s4227_s5, 1152 }
 0x2a9   :  { %p2456_p10 = scmp.ne.s32.totalorder %s4227_s5, %s2455_s15  ;;  %p2459_p11 = scmp.lt.u32.totalorder %s2455_s15, %s4227_s5 }
 0x2ab   :  { %p2461_p12 = pnand %p2459_p11, %p2456_p10 }
 0x2ad   :  { %2464 = shalt.err (!%p2461_p12)
}
 0x2ae   :  { %s2477_s20 = smov 384   ;;  %s2478_s21 = smov 24  }
 0x2af   :  { %2192 = dma.vmem_to_hbm [thread:$0]  %s2187_s11, 1152, %s4227_s5, [#allocation4], %s2477_s20, %s2477_s20, %s2478_s21  }
 0x2b0   :  { %2467 = dma.done.wait [#allocation4], 1152  }
 0x2b1   :  { %2468 = vsyncadd [#allocation4], 4294966144 }
 0x2b2   :  { %2196 = vsyncpa [#allocation4], 1 }
 0x2b3   :  { %2197 = vsyncpa [#allocation5], 1 }

</bundles_post_ra>
